<compile_context>
chip_gen: v7x
topology: tpu7x:2x2x1
jax: 0.10.0
libtpu: 0.0.40
codegen_flags: <defaults>
</compile_context>

<pallas_src>
import functools

import jax
import jax.numpy as jnp
from jax import lax
from jax.experimental import pallas as pl
from jax.experimental.pallas import tpu as pltpu


_LANE = 128
_MiB = 1024 * 1024


def _round_up(x: int, m: int) -> int:
    return ((x + m - 1) // m) * m


def _sublane_multiple(itemsize: int) -> int:
    # 8 for 32-bit, 16 for 16-bit, 32 for 8-bit dtypes.
    return max(8, 32 // max(int(itemsize), 1))


def _vmem_budget():
    """(pipeline working-set budget, vmem_limit cap) — generation aware."""
    try:
        cap = int(pltpu.get_tpu_info().vmem_capacity_bytes)
    except Exception:
        cap = 64 * _MiB  # assume the smallest (v7x-class) VMEM if unknown
    if cap >= 96 * _MiB:            # v5e / v6e class (128 MiB VMEM)
        return 40 * _MiB, 64 * _MiB
    return 24 * _MiB, 48 * _MiB     # v7x class (64 MiB VMEM)


def _per_row_vmem_bytes(row_elems, out_cols, in_itemsize, out_itemsize):
    """Lane-padded VMEM bytes consumed per block row by the whole pipeline."""
    in_row = _round_up(row_elems, _LANE) * in_itemsize     # padded input row
    out_row = _round_up(out_cols, _LANE) * out_itemsize    # padded output row
    f32_row = _round_up(row_elems, _LANE) * 4              # f32 elementwise temps
    # 2 inputs x 2 pipeline buffers + 1 output x 2 buffers
    # + ~3 live block-sized f32 intermediates inside the kernel body.
    return 4 * in_row + 2 * out_row + 3 * f32_row


def _choose_packing(n_rows: int, d: int, itemsize: int) -> int:
    """How many consecutive logical rows to pack into the lane dimension.

    Rows smaller than 512 B (128 f32 lanes) leave most lanes/VMEM idle and
    degenerate the HBM->VMEM DMA into short lines.  Pack the largest divisor
    of n_rows that brings a packed row to ~2 KiB, capped at 64 so the
    in-kernel segment-sum matmul stays negligible on every generation."""
    row_bytes = d * itemsize
    if n_rows <= 1 or row_bytes >= 512:
        return 1
    g_cap = min(64, max(1, 2048 // max(row_bytes, 1)))
    for g in range(g_cap, 1, -1):
        if n_rows % g == 0:
            return g
    return 1


def _pick_rows_per_block(n_rows, row_elems, out_cols, in_itemsize, out_itemsize,
                         budget_bytes):
    """Rows per block, sized purely by (lane-padded) bytes."""
    mult = max(_sublane_multiple(in_itemsize), _sublane_multiple(out_itemsize))
    per_row = _per_row_vmem_bytes(row_elems, out_cols, in_itemsize, out_itemsize)
    in_block_row = _round_up(row_elems, _LANE) * in_itemsize

    rt = budget_bytes // max(per_row, 1)
    rt = max((rt // mult) * mult, mult)

    if rt >= n_rows:
        # Everything fits in one block.  If it is big enough, split into two
        # blocks so v7x's two TensorCores both get work (harmless on 1-TC
        # v5e / v6e where the grid is just a serial loop).
        if n_rows >= 2 * mult and n_rows * in_block_row >= 2 * _MiB:
            half = _round_up(pl.cdiv(n_rows, 2), mult)
            if half < n_rows:
                return half
        return n_rows

    # Prefer an even number of grid steps (v7x megacore balance) as long as
    # blocks stay >= ~1 MiB.
    steps = pl.cdiv(n_rows, rt)
    if steps % 2 == 1:
        rt_even = _round_up(pl.cdiv(n_rows, steps + 1), mult)
        if mult <= rt_even < n_rows and rt_even * in_block_row >= _MiB:
            rt = rt_even
    return rt


def _rowsum_kernel(xh_ref, x_ref, o_ref):
    """Per-row sum of squared differences; f32 accumulation (VPU + XLU)."""
    diff = xh_ref[...].astype(jnp.float32) - x_ref[...].astype(jnp.float32)
    o_ref[...] = jnp.sum(diff * diff, axis=-1, keepdims=True).astype(o_ref.dtype)


def _make_packed_kernel(seg_len: int, num_seg: int):
    """Kernel for lane-packed rows: each VMEM row holds `num_seg` logical rows
    of `seg_len` elements.  Per-row sums are recovered with a 0/1
    block-diagonal segment-sum matmul on the MXU (idle in this HBM-bound
    kernel); HIGHEST precision keeps the f32 accumulation exact enough."""
    total = seg_len * num_seg

    def kernel(xh_ref, x_ref, o_ref):
        diff = xh_ref[...].astype(jnp.float32) - x_ref[...].astype(jnp.float32)
        sq = diff * diff                                     # (rt, num_seg*seg_len)
        k = lax.broadcasted_iota(jnp.int32, (total, num_seg), 0)
        j = lax.broadcasted_iota(jnp.int32, (total, num_seg), 1)
        lo = j * seg_len
        seg = ((k >= lo) & (k < lo + seg_len)).astype(jnp.float32)
        acc = jnp.dot(sq, seg, precision=lax.Precision.HIGHEST,
                      preferred_element_type=jnp.float32)    # (rt, num_seg)
        o_ref[...] = acc.astype(o_ref.dtype)

    return kernel


@functools.partial(jax.jit, static_argnames=("out_dtype",))
def reconstruction_loss(x_hat: jax.Array, x: jax.Array, out_dtype=None) -> jax.Array:
    """Pallas TPU equivalent of ReconstructionLoss.forward."""
    assert x_hat.shape == x.shape, "x_hat and x must have identical shapes"
    *lead, d = x_hat.shape
    n = 1
    for s in lead:
        n *= s
    n = max(n, 1)

    in_dtype = jnp.dtype(x_hat.dtype)
    out_dt = jnp.dtype(out_dtype) if out_dtype is not None else in_dtype
    in_itemsize = in_dtype.itemsize
    out_itemsize = out_dt.itemsize

    # Lane-packing for small rows (free reshape of the contiguous buffer).
    g = _choose_packing(n, d, in_itemsize)
    if g > 1:
        n_rows, row_elems, out_cols = n // g, g * d, g
        kernel = _make_packed_kernel(seg_len=d, num_seg=g)
    else:
        n_rows, row_elems, out_cols = n, d, 1
        kernel = _rowsum_kernel

    xh2 = x_hat.reshape(n_rows, row_elems)
    x2 = x.reshape(n_rows, row_elems)

    budget, limit_cap = _vmem_budget()
    rt = _pick_rows_per_block(n_rows, row_elems, out_cols, in_itemsize,
                              out_itemsize, budget)
    grid = (pl.cdiv(n_rows, rt),)

    # Scoped-VMEM limit sized from the lane-padded footprint (+ small slack
    # for the in-kernel segment matrix / iotas), clamped generation-safely.
    footprint = rt * _per_row_vmem_bytes(row_elems, out_cols, in_itemsize,
                                         out_itemsize) + _MiB
    vmem_limit = int(min(limit_cap, max(32 * _MiB, footprint + 4 * _MiB)))

    out = pl.pallas_call(
        kernel,
        out_shape=jax.ShapeDtypeStruct((n_rows, out_cols), out_dt),
        grid_spec=pltpu.PrefetchScalarGridSpec(
            num_scalar_prefetch=0,
            grid=grid,
            in_specs=[
                pl.BlockSpec((rt, row_elems), lambda i: (i, 0)),
                pl.BlockSpec((rt, row_elems), lambda i: (i, 0)),
            ],
            out_specs=pl.BlockSpec((rt, out_cols), lambda i: (i, 0)),
        ),
        compiler_params=pltpu.CompilerParams(
            dimension_semantics=("parallel",),
            vmem_limit_bytes=vmem_limit,
        ),
    )(xh2, x2)

    # Row-major (n_rows, out_cols) == per-row losses in original order.
    return out.reshape(tuple(lead))


if __name__ == "__main__":
    key = jax.random.PRNGKey(0)

    def _check(k, shape):
        k1, k2 = jax.random.split(k)
        xh = jax.random.normal(k1, shape, dtype=jnp.float32)
        xx = jax.random.normal(k2, shape, dtype=jnp.float32)
        got = jax.block_until_ready(reconstruction_loss(xh, xx))
        ref = jnp.sum((xh - xx) ** 2, axis=-1)
        assert got.shape == ref.shape, (shape, got.shape, ref.shape)
        assert jnp.allclose(got, ref, rtol=2e-5, atol=1e-5), shape

    keys = jax.random.split(key, 5)
    _check(keys[0], (2, 8, 32))     # module-typical (batch, seq, hidden): packed path (g=16)
    _check(keys[1], (3, 5, 48))     # odd sizes, packed path (g=5), unaligned lanes
    _check(keys[2], (17, 32))       # small D, prime N -> unpacked fallback
    _check(keys[3], (4, 7, 256))    # large-D per-row reduce path, single block
    _check(keys[4], (4, 750, 512))  # large-D, multi-step grid + ragged last block

    print("KERNEL_OK")
</pallas_src>

<mosaic_0001>
module attributes {stable_mosaic.version = 11 : i64} {
  func.func @kernel(%arg0: i32, %arg1: memref<1x512xf32, #tpu.memory_space<vmem>>, %arg2: memref<1x512xf32, #tpu.memory_space<vmem>>, %arg3: memref<1x16xf32, #tpu.memory_space<vmem>>) attributes {dimension_semantics = [#tpu.dimension_semantics<parallel>], iteration_bounds = array<i64: 1>, scalar_prefetch = 0 : i64, scratch_operands = 0 : i64, tpu.core_type = #tpu.core_type<tc>, window_params = [{transform_indices = @transform_0, window_bounds = array<i64: 1, 512>}, {transform_indices = @transform_1, window_bounds = array<i64: 1, 512>}, {transform_indices = @transform_2, window_bounds = array<i64: 1, 16>}]} {
    %c0 = arith.constant 0 : index
    %c0_0 = arith.constant 0 : index
    %0 = vector.load %arg1[%c0, %c0_0] : memref<1x512xf32, #tpu.memory_space<vmem>>, vector<1x512xf32>
    %c0_1 = arith.constant 0 : index
    %c0_2 = arith.constant 0 : index
    %1 = vector.load %arg2[%c0_1, %c0_2] : memref<1x512xf32, #tpu.memory_space<vmem>>, vector<1x512xf32>
    %2 = arith.subf %0, %1 : vector<1x512xf32>
    %3 = arith.mulf %2, %2 : vector<1x512xf32>
    %4 = tpu.iota {dimensions = array<i32: 0>} : vector<512x16xi32>
    %5 = tpu.iota {dimensions = array<i32: 1>} : vector<512x16xi32>
    %c32_i32 = arith.constant 32 : i32
    %6 = vector.broadcast %c32_i32 : i32 to vector<512x16xi32>
    %7 = arith.muli %5, %6 : vector<512x16xi32>
    %8 = arith.cmpi sge, %4, %7 : vector<512x16xi32>
    %c32_i32_3 = arith.constant 32 : i32
    %9 = vector.broadcast %c32_i32_3 : i32 to vector<512x16xi32>
    %10 = arith.addi %7, %9 : vector<512x16xi32>
    %11 = arith.cmpi slt, %4, %10 : vector<512x16xi32>
    %12 = arith.andi %8, %11 : vector<512x16xi1>
    %13 = arith.extui %12 : vector<512x16xi1> to vector<512x16xi32>
    %14 = arith.sitofp %13 : vector<512x16xi32> to vector<512x16xf32>
    %cst = arith.constant dense<0.000000e+00> : vector<1x16xf32>
    %15 = tpu.matmul %3, %14, %cst {dimension_numbers = #tpu.dot_dimension_numbers<[1], [0], [0], [1], [0, 0, 1, 1], [], []>, precision = #tpu.contract_precision<fp32>} : vector<1x512xf32>, vector<512x16xf32>, vector<1x16xf32> -> vector<1x16xf32>
    %c0_4 = arith.constant 0 : index
    %c0_5 = arith.constant 0 : index
    %16 = vector.load %arg3[%c0_4, %c0_5] : memref<1x16xf32, #tpu.memory_space<vmem>>, vector<1x16xf32>
    tpu.vector_store %arg3[%c0_4, %c0_5], %15 {strides = array<i32>} : memref<1x16xf32, #tpu.memory_space<vmem>>, vector<1x16xf32>,
    return
  }
  func.func @transform_0(%arg0: i32) -> (i32, i32) {
    %c0_i32 = arith.constant 0 : i32
    %c0_i32_0 = arith.constant 0 : i32
    return %arg0, %c0_i32 : i32, i32
  }
  func.func @transform_1(%arg0: i32) -> (i32, i32) {
    %c0_i32 = arith.constant 0 : i32
    %c0_i32_0 = arith.constant 0 : i32
    return %arg0, %c0_i32 : i32, i32
  }
  func.func @transform_2(%arg0: i32) -> (i32, i32) {
    %c0_i32 = arith.constant 0 : i32
    %c0_i32_0 = arith.constant 0 : i32
    return %arg0, %c0_i32 : i32, i32
  }
}

</mosaic_0001>

<bundles_post_ra>
// kernel: reconstruction_loss.1
= control target key start
LH: loop header
LB: loop body
LE: loop exit
PB: predicated region body
PF: predicated region fallthrough
CT: control target
= control target key end

     0   :  { %v15_v0 = vlaneseq  ;;  %v5196_v15 = vmov 0.0   ;;  %v5200_v24 = vmov 1.0|1.0   ;;  %v5335_v28 = vmov 0  ;;  %s5152_s0 = inlined_call_operand.vmem [shape: f32[1,512], index: 0, kind: input, shape index: {}]   ;;  %s5153_s1 = inlined_call_operand.vmem [shape: f32[1,512], index: 1, kind: input, shape index: {}]   ;;  %s5154_s2 = inlined_call_operand.vmem [shape: f32[1,16], index: 2, kind: output, shape index: {}]  }
   0x1   :  { %v11_v3 = vld [vmem:[%s5152_s0] sm:$0xf]  ;;  %v5337_v37 = vmov 0  ;;  %v5341_v50 = vmov 0 }
   0x2   :  { %v3234_v1 = vshrl.u32 %v15_v0, 7  ;;  %v81_v2 = vand.u32 127, %v15_v0  ;;  %v12_v4 = vld [vmem:[%s5153_s1] sm:$0xf] }
   0x3   :  { %v3259_v14 = vsub.f32 %v11_v3, %v12_v4 }
   0x4   :  { %v32_v5 = vadd.s32 128, %v3234_v1  ;;  %v33_v6 = vadd.s32 136, %v3234_v1  ;;  %v3244_v7 = vmul.u32 32, %v81_v2  ;;  %v17_v8 = vadd.s32 8, %v3234_v1 }
   0x5   :  { %v34_v9 = vadd.s32 144, %v3234_v1  ;;  %v35_v10 = vadd.s32 152, %v3234_v1  ;;  %v3250_v11 = vadd.s32 16, %v3234_v1  ;;  %v3257_v13 = vadd.s32 24, %v3234_v1 }
   0x6   :  { %vm99_vm0 = vcmp.ge.s32.totalorder %v32_v5, %v3244_v7  ;;  %v3254_v12 = vadd.s32 32, %v3244_v7  ;;  %vm100_vm1 = vcmp.ge.s32.totalorder %v33_v6, %v3244_v7  ;;  %vm83_vm2 = vcmp.ge.s32.totalorder %v3234_v1, %v3244_v7 }
   0x7   :  { %vm84_vm3 = vcmp.ge.s32.totalorder %v17_v8, %v3244_v7  ;;  %vm101_vm4 = vcmp.ge.s32.totalorder %v34_v9, %v3244_v7  ;;  %vm102_vm7 = vcmp.ge.s32.totalorder %v35_v10, %v3244_v7  ;;  %v36_v17 = vadd.s32 160, %v3234_v1 }
   0x8   :  { %vm164_vm5 = vcmp.lt.s32.totalorder %v32_v5, %v3254_v12  ;;  %vm165_vm6 = vcmp.lt.s32.totalorder %v33_v6, %v3254_v12  ;;  %vm148_vm10 = vcmp.lt.s32.totalorder %v3234_v1, %v3254_v12  ;;  %vm149_vm11 = vcmp.lt.s32.totalorder %v17_v8, %v3254_v12 }
   0x9   :  { %vm228_vm9 = vmand %vm99_vm0, %vm164_vm5  ;;  %vm166_vm12 = vcmp.lt.s32.totalorder %v34_v9, %v3254_v12  ;;  %vm167_vm13 = vcmp.lt.s32.totalorder %v35_v10, %v3254_v12  ;;  %v37_v18 = vadd.s32 168, %v3234_v1  ;;  %v3289_v22 = vadd.s32 32, %v3234_v1 }
   0xa   :  { %vm229_vm14 = vmand %vm100_vm1, %vm165_vm6  ;;  %v2171_v16 = vsel %vm228_vm9, 1.0, %v5196_v15  ;;  %v3292_v23 = vadd.s32 40, %v3234_v1  ;;  %vm150_vm5 = vcmp.lt.s32.totalorder %v3250_v11, %v3254_v12  ;;  %vm151_vm6 = vcmp.lt.s32.totalorder %v3257_v13, %v3254_v12 }
   0xb   :  { %v2172_v19 = vsel %vm229_vm14, 1.0, %v5196_v15  ;;  %vm3282_vm0 = vmpackc.low %vm229_vm14, %vm228_vm9  ;;  %v3286_v21 = vsub.f32 %v2171_v16, %v2171_v16  ;;  %vm104_vm15 = vcmp.ge.s32.totalorder %v37_v18, %v3244_v7  ;;  %vm168_vm8 = vcmp.lt.s32.totalorder %v36_v17, %v3254_v12 }
   0xc   :  { %2832 = vmatprep.subr.msk.bf16.mxu0 %vm3282_vm0, %v5200_v24  ;;  %v3297_v25 = vsub.f32 %v2172_v19, %v2172_v19  ;;  %vm212_vm1 = vmand %vm83_vm2, %vm148_vm10  ;;  %vm169_vm2 = vcmp.lt.s32.totalorder %v37_v18, %v3254_v12  ;;  %vm87_vm9 = vcmp.ge.s32.totalorder %v3289_v22, %v3244_v7  ;;  %v38_v35 = vadd.s32 176, %v3234_v1 }
   0xd   :  { %vm213_vm14 = vmand %vm84_vm3, %vm149_vm11  ;;  %v2155_v26 = vsel %vm212_vm1, 1.0, %v5196_v15  ;;  %v5189_v31 = vand.u32 4294901760, %v3286_v21  ;;  %vm153_vm3 = vcmp.lt.s32.totalorder %v3292_v23, %v3254_v12  ;;  %v39_v40 = vadd.s32 184, %v3234_v1 }
   0xe   :  { %v2156_v27 = vsel %vm213_vm14, 1.0, %v5196_v15  ;;  %vm3319_vm10 = vmpackc.low %vm213_vm14, %vm212_vm1  ;;  %v3323_v29 = vsub.f32 %v2155_v26, %v2155_v26  ;;  %vm152_vm1 = vcmp.lt.s32.totalorder %v3289_v22, %v3254_v12  ;;  %v5188_v32 = vand.u32 4294901760, %v3297_v25 }
   0xf   :  { %v5336_v28 = vsel %vm3319_vm10, 4294967295, %v5335_v28  ;;  %2834 = vmatpush3.bf16.msk.msra.mxu0 %vm3319_vm10, %v5200_v24  ;;  %v3332_v30 = vsub.f32 %v2156_v27, %v2156_v27  ;;  %vm230_vm11 = vmand %vm101_vm4, %vm166_vm12  ;;  %v653_v38 = vsub.f32 %v3286_v21, %v5189_v31  ;;  %v3379_v44 = vadd.s32 48, %v3234_v1 }
  0x10   :  { %vm231_vm14 = vmand %vm102_vm7, %vm167_vm13  ;;  %v2173_v33 = vsel %vm230_vm11, 1.0, %v5196_v15  ;;  %v5177_v34 = vand.u32 4294901760, %v3323_v29  ;;  %v660_v39 = vsub.f32 %v3297_v25, %v5188_v32  ;;  %vm5339_vm7 = vcmp.ge.s32.totalorder %v3250_v11, %v3244_v7 }
  0x11   :  { %v2174_v36 = vsel %vm231_vm14, 1.0, %v5196_v15  ;;  %vm3352_vm4 = vmpackc.low %vm231_vm14, %vm230_vm11  ;;  %v3366_v41 = vsub.f32 %v2173_v33, %v2173_v33  ;;  %v5176_v43 = vand.u32 4294901760, %v3332_v30  ;;  %vm5340_vm13 = vcmp.ge.s32.totalorder %v3257_v13, %v3244_v7 }
  0x12   :  { %v5338_v37 = vsel %vm3352_vm4, 4294967295, %v5337_v37  ;;  %2836 = vmatprep.subr.msk.bf16.mxu0 %vm3352_vm4, %v5200_v24  ;;  %vm214_vm12 = vmand %vm5339_vm7, %vm150_vm5  ;;  %v541_v42 = vsub.f32 %v3323_v29, %v5177_v34  ;;  %v3381_v45 = vsub.f32 %v2174_v36, %v2174_v36  ;;  %v654_v47 = vand.u32 4294901760, %v653_v38 }
  0x13   :  { %vm215_vm11 = vmand %vm5340_vm13, %vm151_vm6  ;;  %v2157_v46 = vsel %vm214_vm12, 1.0, %v5196_v15  ;;  %v661_v48 = vand.u32 4294901760, %v660_v39  ;;  %v548_v52 = vsub.f32 %v3332_v30, %v5176_v43  ;;  %vm5343_vm6 = vcmp.ge.s32.totalorder %v36_v17, %v3244_v7 }
  0x14   :  { %v2158_v49 = vsel %vm215_vm11, 1.0, %v5196_v15  ;;  %vm3391_vm5 = vmpackc.low %vm215_vm11, %vm214_vm12  ;;  %v542_v51 = vand.u32 4294901760, %v541_v42  ;;  %v3402_v53 = vsub.f32 %v2157_v46, %v2157_v46  ;;  %vm106_vm12 = vcmp.ge.s32.totalorder %v39_v40, %v3244_v7 }
  0x15   :  { %v5342_v50 = vsel %vm3391_vm5, 4294967295, %v5341_v50  ;;  %2838 = vmatpush3.bf16.msk.msra.mxu0 %vm3391_vm5, %v5200_v24  ;;  %v3404_v54 = vsub.f32 %v2158_v49, %v2158_v49  ;;  %vm232_vm7 = vmand %vm5343_vm6, %vm168_vm8  ;;  %v2863_v55 = vpack.c.bf16 %v661_v48, %v654_v47  ;;  %v549_v57 = vand.u32 4294901760, %v548_v52 }
  0x16   :  { %vm233_vm13 = vmand %vm104_vm15, %vm169_vm2  ;;  %v2175_v56 = vsel %vm232_vm7, 1.0, %v5196_v15  ;;  %vm170_vm11 = vcmp.lt.s32.totalorder %v38_v35, %v3254_v12  ;;  %v23_v58 = vadd.s32 56, %v3234_v1  ;;  %vm171_vm8 = vcmp.lt.s32.totalorder %v39_v40, %v3254_v12 }
  0x17   :  { %v2176_v59 = vsel %vm233_vm13, 1.0, %v5196_v15  ;;  %vm3419_vm14 = vmpackc.low %vm233_vm13, %vm232_vm7  ;;  %2864 = vmatprep.subr.bf16.mxu1 %v2863_v55  ;;  %vm89_vm6 = vcmp.ge.s32.totalorder %v3379_v44, %v3244_v7  ;;  %v5175_v61 = vand.u32 4294901760, %v3366_v41  ;;  %v3430_v62 = vsub.f32 %v2175_v56, %v2175_v56 }
  0x18   :  { %2840 = vmatprep.subr.msk.bf16.mxu0 %vm3419_vm14, %v5200_v24  ;;  %v3432_v63 = vsub.f32 %v2176_v59, %v2176_v59  ;;  %vm216_vm15 = vmand %vm87_vm9, %vm152_vm1  ;;  %v2865_v0 = vpack.c.bf16 %v549_v57, %v542_v51  ;;  %vm154_vm2 = vcmp.lt.s32.totalorder %v3379_v44, %v3254_v12  ;;  %vm5346_vm7 = vcmp.ge.s32.totalorder %v3292_v23, %v3244_v7 }
  0x19   :  { %vm217_vm13 = vmand %vm5346_vm7, %vm153_vm3  ;;  %v2159_v2 = vsel %vm216_vm15, 1.0, %v5196_v15  ;;  %v667_v3 = vsub.f32 %v3366_v41, %v5175_v61  ;;  %v5173_v4 = vand.u32 4294901760, %v3381_v45  ;;  %v5172_v5 = vand.u32 4294901760, %v3402_v53 }
  0x1a   :  { %v2160_v6 = vsel %vm217_vm13, 1.0, %v5196_v15  ;;  %vm3455_vm9 = vmpackc.low %vm217_vm13, %vm216_vm15  ;;  %2866 = vmatpush3.bf16.msra.mxu1 %v2865_v0  ;;  %vm90_vm1 = vcmp.ge.s32.totalorder %v23_v58, %v3244_v7  ;;  %v5171_v9 = vand.u32 4294901760, %v3404_v54  ;;  %v40_v10 = vadd.s32 192, %v3234_v1 }
  0x1b   :  { %2842 = vmatpush3.bf16.msk.msra.mxu0 %vm3455_vm9, %v5200_v24  ;;  %vm5349_vm3 = vcmp.ge.s32.totalorder %v38_v35, %v3244_v7  ;;  %vm155_vm15 = vcmp.lt.s32.totalorder %v23_v58, %v3254_v12  ;;  %v668_v11 = vand.u32 4294901760, %v667_v3  ;;  %v674_v13 = vsub.f32 %v3381_v45, %v5173_v4  ;;  %vm235_vm13 = vmand %vm106_vm12, %vm171_vm8 }
  0x1c   :  { %vm234_vm7 = vmand %vm5349_vm3, %vm170_vm11  ;;  %v555_v16 = vsub.f32 %v3402_v53, %v5172_v5  ;;  %v3476_v17 = vsub.f32 %v2159_v2, %v2159_v2  ;;  %v562_v19 = vsub.f32 %v3404_v54, %v5171_v9  ;;  %v41_v22 = vadd.s32 200, %v3234_v1 }
  0x1d   :  { %v2177_v18 = vsel %vm234_vm7, 1.0, %v5196_v15  ;;  %v3487_v23 = vsub.f32 %v2160_v6, %v2160_v6  ;;  %v2178_v26 = vsel %vm235_vm13, 1.0, %v5196_v15  ;;  %vm3490_vm11 = vmpackc.low %vm235_vm13, %vm234_vm7  ;;  %v5350_v27 = vmov 0 }
  0x1e   :  { %v5351_v27 = vsel %vm3490_vm11, 4294967295, %v5350_v27  ;;  %v675_v33 = vand.u32 4294901760, %v674_v13  ;;  %v556_v35 = vand.u32 4294901760, %v555_v16  ;;  %2844 = vmatprep.subr.msk.bf16.mxu0 %vm3490_vm11, %v5200_v24  ;;  %v3497_v36 = vsub.f32 %v2177_v18, %v2177_v18  ;;  %vm218_vm12 = vmand %vm89_vm6, %vm154_vm2 }
  0x1f   :  { %v563_v38 = vand.u32 4294901760, %v562_v19  ;;  %vm107_vm8 = vcmp.ge.s32.totalorder %v40_v10, %v3244_v7  ;;  %vm172_vm3 = vcmp.lt.s32.totalorder %v40_v10, %v3254_v12  ;;  %vm219_vm7 = vmand %vm90_vm1, %vm155_vm15  ;;  %vm108_vm13 = vcmp.ge.s32.totalorder %v41_v22, %v3244_v7 }
  0x20   :  { %v2867_v39 = vpack.c.bf16 %v675_v33, %v668_v11  ;;  %vm173_vm11 = vcmp.lt.s32.totalorder %v41_v22, %v3254_v12  ;;  %v24_v40 = vadd.s32 64, %v3234_v1  ;;  %v3514_v42 = vsub.f32 %v2178_v26, %v2178_v26  ;;  %vm3517_vm6 = vmpackc.low %vm219_vm7, %vm218_vm12 }
  0x21   :  { %v2161_v44 = vsel %vm218_vm12, 1.0, %v5196_v15  ;;  %v5352_v46 = vmov 0  ;;  %v2869_v47 = vpack.c.bf16 %v563_v38, %v556_v35  ;;  %v25_v48 = vadd.s32 72, %v3234_v1  ;;  %2846 = vmatpush3.bf16.msk.msra.mxu0 %vm3517_vm6, %v5200_v24  ;;  %vm236_vm2 = vmand %vm107_vm8, %vm172_vm3 }
  0x22   :  { %v5353_v46 = vsel %vm3517_vm6, 4294967295, %v5352_v46  ;;  %v2162_v49 = vsel %vm219_vm7, 1.0, %v5196_v15  ;;  %2868 = vmatprep.subr.bf16.mxu1 %v2867_v39  ;;  %vm91_vm1 = vcmp.ge.s32.totalorder %v24_v40, %v3244_v7  ;;  %vm156_vm15 = vcmp.lt.s32.totalorder %v24_v40, %v3254_v12  ;;  %vm237_vm12 = vmand %vm108_vm13, %vm173_vm11 }
  0x23   :  { %v5168_v51 = vand.u32 4294901760, %v3430_v62  ;;  %2870 = vmatpush3.bf16.msra.mxu1 %v2869_v47  ;;  %v2179_v52 = vsel %vm236_vm2, 1.0, %v5196_v15  ;;  %vm92_vm7 = vcmp.ge.s32.totalorder %v25_v48, %v3244_v7  ;;  %vm157_vm6 = vcmp.lt.s32.totalorder %v25_v48, %v3254_v12  ;;  %vm3542_vm8 = vmpackc.low %vm237_vm12, %vm236_vm2 }
  0x24   :  { %v5167_v55 = vand.u32 4294901760, %v3432_v63  ;;  %v3539_v56 = vsub.f32 %v2161_v44, %v2161_v44  ;;  %v2180_v57 = vsel %vm237_vm12, 1.0, %v5196_v15  ;;  %v5354_v58 = vmov 0  ;;  %2848 = vmatprep.subr.msk.bf16.mxu0 %vm3542_vm8, %v5200_v24  ;;  %vm220_vm11 = vmand %vm91_vm1, %vm156_vm15 }
  0x25   :  { %v5355_v58 = vsel %vm3542_vm8, 4294967295, %v5354_v58  ;;  %v681_v59 = vsub.f32 %v3430_v62, %v5168_v51  ;;  %v5164_v0 = vand.u32 4294901760, %v3476_v17  ;;  %v3550_v2 = vsub.f32 %v2162_v49, %v2162_v49  ;;  %vm221_vm3 = vmand %vm92_vm7, %vm157_vm6 }
  0x26   :  { %v688_v3 = vsub.f32 %v3432_v63, %v5167_v55  ;;  %v5163_v6 = vand.u32 4294901760, %v3487_v23  ;;  %v42_v10 = vadd.s32 208, %v3234_v1  ;;  %v3564_v11 = vsub.f32 %v2179_v52, %v2179_v52  ;;  %vm3575_vm13 = vmpackc.low %vm221_vm3, %vm220_vm11 }
  0x27   :  { %v682_v13 = vand.u32 4294901760, %v681_v59  ;;  %v569_v16 = vsub.f32 %v3476_v17, %v5164_v0  ;;  %v43_v18 = vadd.s32 216, %v3234_v1  ;;  %v3572_v19 = vsub.f32 %v2180_v57, %v2180_v57  ;;  %2850 = vmatpush3.bf16.msk.msra.mxu0 %vm3575_vm13, %v5200_v24 }
  0x28   :  { %v2163_v22 = vsel %vm220_vm11, 1.0, %v5196_v15  ;;  %v5356_v26 = vmov 0  ;;  %v689_v33 = vand.u32 4294901760, %v688_v3  ;;  %v576_v35 = vsub.f32 %v3487_v23, %v5163_v6 }
  0x29   :  { %v5357_v26 = vsel %vm3575_vm13, 4294967295, %v5356_v26  ;;  %v2164_v38 = vsel %vm221_vm3, 1.0, %v5196_v15  ;;  %v570_v39 = vand.u32 4294901760, %v569_v16  ;;  %vm109_vm6 = vcmp.ge.s32.totalorder %v42_v10, %v3244_v7 }
  0x2a   :  { %5358 = vst [vmem:[#allocation2_spill] sm:$0xff] %v5357_v26  ;;  %vm110_vm2 = vcmp.ge.s32.totalorder %v43_v18, %v3244_v7  ;;  %v2871_v40 = vpack.c.bf16 %v689_v33, %v682_v13  ;;  %v577_v44 = vand.u32 4294901760, %v576_v35  ;;  %vm174_vm1 = vcmp.lt.s32.totalorder %v42_v10, %v3254_v12 }
  0x2b   :  { %vm175_vm15 = vcmp.lt.s32.totalorder %v43_v18, %v3254_v12  ;;  %vm238_vm12 = vmand %vm109_vm6, %vm174_vm1  ;;  %v26_v47 = vadd.s32 80, %v3234_v1  ;;  %v27_v48 = vadd.s32 88, %v3234_v1  ;;  %v5161_v49 = vand.u32 4294901760, %v3497_v36 }
  0x2c   :  { %v5159_v52 = vand.u32 4294901760, %v3514_v42  ;;  %v3594_v57 = vsub.f32 %v2163_v22, %v2163_v22  ;;  %2872 = vmatprep.subr.bf16.mxu1 %v2871_v40  ;;  %v2873_v59 = vpack.c.bf16 %v577_v44, %v570_v39  ;;  %vm239_vm7 = vmand %vm110_vm2, %vm175_vm15  ;;  %v5160_v3 = vand.u32 4294901760, %v3539_v56 }
  0x2d   :  { %v5162_v10 = vand.u32 4294901760, %v3550_v2  ;;  %v3598_v13 = vsub.f32 %v2164_v38, %v2164_v38  ;;  %v2181_v16 = vsel %vm238_vm12, 1.0, %v5196_v15  ;;  %vm3601_vm11 = vmpackc.low %vm239_vm7, %vm238_vm12  ;;  %v5359_v18 = vmov 0 }
  0x2e   :  { %v5360_v18 = vsel %vm3601_vm11, 4294967295, %v5359_v18  ;;  %vm93_vm3 = vcmp.ge.s32.totalorder %v26_v47, %v3244_v7  ;;  %vm94_vm6 = vcmp.ge.s32.totalorder %v27_v48, %v3244_v7  ;;  %2874 = vmatpush3.bf16.msra.mxu1 %v2873_v59  ;;  %v2182_v22 = vsel %vm239_vm7, 1.0, %v5196_v15  ;;  %2852 = vmatprep.subr.msk.bf16.mxu0 %vm3601_vm11, %v5200_v24 }
  0x2f   :  { %5361 = vst [vmem:[#allocation3_spill] sm:$0xff] %v5360_v18  ;;  %vm158_vm2 = vcmp.lt.s32.totalorder %v26_v47, %v3254_v12  ;;  %vm159_vm1 = vcmp.lt.s32.totalorder %v27_v48, %v3254_v12  ;;  %v44_v33 = vadd.s32 224, %v3234_v1  ;;  %v695_v35 = vsub.f32 %v3497_v36, %v5161_v49 }
  0x30   :  { %vm222_vm15 = vmand %vm93_vm3, %vm158_vm2  ;;  %v702_v38 = vsub.f32 %v3514_v42, %v5159_v52  ;;  %v583_v39 = vsub.f32 %v3539_v56, %v5160_v3  ;;  %v590_v40 = vsub.f32 %v3550_v2, %v5162_v10  ;;  %v45_v47 = vadd.s32 232, %v3234_v1 }
  0x31   :  { %vm223_vm12 = vmand %vm94_vm6, %vm159_vm1  ;;  %v2165_v44 = vsel %vm222_vm15, 1.0, %v5196_v15  ;;  %vm111_vm7 = vcmp.ge.s32.totalorder %v44_v33, %v3244_v7  ;;  %vm176_vm3 = vcmp.lt.s32.totalorder %v44_v33, %v3254_v12  ;;  %v3630_v48 = vsub.f32 %v2181_v16, %v2181_v16 }
  0x32   :  { %v3632_v59 = vsub.f32 %v2182_v22, %v2182_v22  ;;  %vm3634_vm2 = vmpackc.low %vm223_vm12, %vm222_vm15  ;;  %v5362_v52 = vmov 0  ;;  %v696_v3 = vand.u32 4294901760, %v695_v35  ;;  %v703_v49 = vand.u32 4294901760, %v702_v38 }
  0x33   :  { %v5363_v52 = vsel %vm3634_vm2, 4294967295, %v5362_v52  ;;  %v2166_v10 = vsel %vm223_vm12, 1.0, %v5196_v15  ;;  %2854 = vmatpush3.bf16.msk.msra.mxu0 %vm3634_vm2, %v5200_v24  ;;  %v584_v6 = vand.u32 4294901760, %v583_v39  ;;  %v591_v0 = vand.u32 4294901760, %v590_v40  ;;  %vm240_vm1 = vmand %vm111_vm7, %vm176_vm3 }
  0x34   :  { %5364 = vst [vmem:[#allocation4_spill] sm:$0xff] %v5363_v52  ;;  %vm112_vm6 = vcmp.ge.s32.totalorder %v45_v47, %v3244_v7  ;;  %v3643_v16 = vsub.f32 %v2165_v44, %v2165_v44  ;;  %v2875_v22 = vpack.c.bf16 %v703_v49, %v696_v3  ;;  %vm177_vm15 = vcmp.lt.s32.totalorder %v45_v47, %v3254_v12 }
  0x35   :  { %v28_v33 = vadd.s32 96, %v3234_v1  ;;  %v2877_v35 = vpack.c.bf16 %v591_v0, %v584_v6  ;;  %vm241_vm11 = vmand %vm112_vm6, %vm177_vm15  ;;  %v2183_v38 = vsel %vm240_vm1, 1.0, %v5196_v15  ;;  %v29_v55 = vadd.s32 104, %v3234_v1 }
  0x36   :  { %v5169_v51 = vand.u32 4294901760, %v3564_v11  ;;  %2876 = vmatprep.subr.bf16.mxu1 %v2875_v22  ;;  %v2184_v39 = vsel %vm241_vm11, 1.0, %v5196_v15  ;;  %vm3651_vm12 = vmpackc.low %vm241_vm11, %vm240_vm1  ;;  %v5365_v40 = vmov 0  ;;  %v5170_v0 = vand.u32 4294901760, %v3572_v19 }
  0x37   :  { %v5366_v40 = vsel %vm3651_vm12, 4294967295, %v5365_v40  ;;  %vm95_vm7 = vcmp.ge.s32.totalorder %v28_v33, %v3244_v7  ;;  %vm160_vm3 = vcmp.lt.s32.totalorder %v28_v33, %v3254_v12  ;;  %v3658_v6 = vsub.f32 %v2166_v10, %v2166_v10  ;;  %2878 = vmatpush3.bf16.msra.mxu1 %v2877_v35  ;;  %2856 = vmatprep.subr.msk.bf16.mxu0 %vm3651_vm12, %v5200_v24 }
  0x38   :  { %5367 = vst [vmem:[#allocation5_spill] sm:$0xff] %v5366_v40  ;;  %vm96_vm6 = vcmp.ge.s32.totalorder %v29_v55, %v3244_v7  ;;  %vm161_vm11 = vcmp.lt.s32.totalorder %v29_v55, %v3254_v12  ;;  %vm224_vm1 = vmand %vm95_vm7, %vm160_vm3  ;;  %v5174_v49 = vand.u32 4294901760, %v3594_v57  ;;  %v3666_v3 = vsub.f32 %v2183_v38, %v2183_v38 }
  0x39   :  { %vm225_vm15 = vmand %vm96_vm6, %vm161_vm11  ;;  %v709_v10 = vsub.f32 %v3564_v11, %v5169_v51  ;;  %v716_v44 = vsub.f32 %v3572_v19, %v5170_v0  ;;  %v5187_v47 = vand.u32 4294901760, %v3598_v13  ;;  %v3675_v22 = vsub.f32 %v2184_v39, %v2184_v39 }
  0x3a   :  { %v2167_v55 = vsel %vm224_vm1, 1.0, %v5196_v15  ;;  %vm3678_vm7 = vmpackc.low %vm225_vm15, %vm224_vm1  ;;  %v5368_v33 = vmov 0  ;;  %v597_v35 = vsub.f32 %v3594_v57, %v5174_v49  ;;  %v46_v38 = vadd.s32 240, %v3234_v1 }
  0x3b   :  { %v5369_v33 = vsel %vm3678_vm7, 4294967295, %v5368_v33  ;;  %v2168_v51 = vsel %vm225_vm15, 1.0, %v5196_v15  ;;  %2858 = vmatpush3.bf16.msk.msra.mxu0 %vm3678_vm7, %v5200_v24  ;;  %v710_v39 = vand.u32 4294901760, %v709_v10  ;;  %v717_v0 = vand.u32 4294901760, %v716_v44 }
  0x3c   :  { %5370 = vst [vmem:[#allocation6_spill] sm:$0xff] %v5369_v33  ;;  %v604_v9 = vsub.f32 %v3598_v13, %v5187_v47  ;;  %v598_v5 = vand.u32 4294901760, %v597_v35  ;;  %v47_v4 = vadd.s32 248, %v3234_v1  ;;  %vm113_vm3 = vcmp.ge.s32.totalorder %v46_v38, %v3244_v7 }
  0x3d   :  { %vm178_vm6 = vcmp.lt.s32.totalorder %v46_v38, %v3254_v12  ;;  %v2879_v49 = vpack.c.bf16 %v717_v0, %v710_v39  ;;  %v30_v43 = vadd.s32 112, %v3234_v1  ;;  %v31_v34 = vadd.s32 120, %v3234_v1 }
  0x3e   :  { %v605_v61 = vand.u32 4294901760, %v604_v9  ;;  %vm242_vm11 = vmand %vm113_vm3, %vm178_vm6  ;;  %v3698_v10 = vsub.f32 %v2167_v55, %v2167_v55  ;;  %vm114_vm1 = vcmp.ge.s32.totalorder %v47_v4, %v3244_v7  ;;  %vm179_vm15 = vcmp.lt.s32.totalorder %v47_v4, %v3254_v12 }
  0x3f   :  { %v5186_v44 = vand.u32 4294901760, %v3630_v48  ;;  %2880 = vmatprep.subr.bf16.mxu1 %v2879_v49  ;;  %vm243_vm7 = vmand %vm114_vm1, %vm179_vm15  ;;  %v2185_v38 = vsel %vm242_vm11, 1.0, %v5196_v15  ;;  %vm97_vm12 = vcmp.ge.s32.totalorder %v30_v43, %v3244_v7  ;;  %vm98_vm3 = vcmp.ge.s32.totalorder %v31_v34, %v3244_v7 }
  0x40   :  { %v2881_v35 = vpack.c.bf16 %v605_v61, %v598_v5  ;;  %v2186_v9 = vsel %vm243_vm7, 1.0, %v5196_v15  ;;  %vm3707_vm6 = vmpackc.low %vm243_vm7, %vm242_vm11  ;;  %v5371_v0 = vmov 0  ;;  %vm162_vm2 = vcmp.lt.s32.totalorder %v30_v43, %v3254_v12 }
  0x41   :  { %v5372_v0 = vsel %vm3707_vm6, 4294967295, %v5371_v0  ;;  %vm163_vm13 = vcmp.lt.s32.totalorder %v31_v34, %v3254_v12  ;;  %v723_v61 = vsub.f32 %v3630_v48, %v5186_v44  ;;  %v3716_v4 = vsub.f32 %v2168_v51, %v2168_v51  ;;  %2860 = vmatprep.subr.msk.bf16.mxu0 %vm3707_vm6, %v5200_v24  ;;  %vm226_vm1 = vmand %vm97_vm12, %vm162_vm2 }
  0x42   :  { %5373 = vst [vmem:[#allocation7_spill] sm:$0xff] %v5372_v0  ;;  %2882 = vmatpush3.bf16.msra.mxu1 %v2881_v35  ;;  %v5190_v5 = vand.u32 4294901760, %v3632_v59  ;;  %v5195_v49 = vand.u32 4294901760, %v3643_v16  ;;  %v5204_v43 = vand.u32 4294901760, %v3658_v6  ;;  %v3724_v55 = vsub.f32 %v2185_v38, %v2185_v38  ;;  %vm227_vm7 = vmand %vm98_vm3, %vm163_vm13 }
  0x43   :  { %v2169_v34 = vsel %vm226_vm1, 1.0, %v5196_v15  ;;  %v3729_v51 = vmul.f32 %v3259_v14, %v3259_v14  ;;  %v411_v39 = vsub.s32 1, %v3234_v1  ;;  %v3732_v35 = vsub.f32 %v2186_v9, %v2186_v9  ;;  %vm3734_vm2 = vmpackc.low %vm227_vm7, %vm226_vm1 }
  0x44   :  { %v5375_v44 = vmov 0  ;;  %v724_v47 = vand.u32 4294901760, %v723_v61  ;;  %v730_v38 = vsub.f32 %v3632_v59, %v5190_v5  ;;  %v611_v32 = vsub.f32 %v3643_v16, %v5195_v49  ;;  %2862 = vmatpush3.bf16.msk.msra.mxu0 %vm3734_vm2, %v5200_v24 }
  0x45   :  { %5374 = vst [vmem:[#allocation8_spill] sm:$0xff] %v3729_v51  ;;  %v5376_v44 = vsel %vm3734_vm2, 4294967295, %v5375_v44  ;;  %v2170_v14 = vsel %vm227_vm7, 1.0, %v5196_v15  ;;  %v618_v9 = vsub.f32 %v3658_v6, %v5204_v43  ;;  %v412_v61 = vrot.slane %v3729_v51, %v411_v39 }
  0x46   :  { %5377 = vst [vmem:[#allocation9_spill] sm:$0xff] %v5376_v44  ;;  %v2895_v31 = vpack.c.bf16 %v3297_v25, %v3286_v21  ;;  %v3754_v5 = vsub.f32 %v2169_v34, %v2169_v34  ;;  %v731_v0 = vand.u32 4294901760, %v730_v38  ;;  %v612_v33 = vand.u32 4294901760, %v611_v32 }
  0x47   :  { %v407_v49 = vsub.s32 0, %v3234_v1  ;;  %v619_v15 = vand.u32 4294901760, %v618_v9  ;;  %v3757_v40 = vand.u32 4294901760, %v412_v61  ;;  %v5210_v24 = vand.u32 4294901760, %v3666_v3 }
  0x48   :  { %5378 = vst [vmem:[#allocation10_spill] sm:$0xff] %v3754_v5  ;;  %2896 = vmatprep.subr.bf16.mxu0 %v2895_v31  ;;  %v5209_v44 = vand.u32 4294901760, %v3675_v22  ;;  %v2883_v43 = vpack.c.bf16 %v731_v0, %v724_v47  ;;  %v5211_v52 = vand.u32 4294901760, %v3698_v10  ;;  %v5216_v34 = vand.u32 4294901760, %v3716_v4 }
  0x49   :  { %5379 = vst [vmem:[#allocation11_spill] sm:$0xff] %v3757_v40  ;;  %v408_v39 = vrot.slane %v3729_v51, %v407_v49  ;;  %v2885_v18 = vpack.c.bf16 %v619_v15, %v612_v33  ;;  %v3765_v32 = vsub.f32 %v412_v61, %v3757_v40  ;;  %v737_v38 = vsub.f32 %v3666_v3, %v5210_v24 }
  0x4a   :  { %v744_v31 = vsub.f32 %v3675_v22, %v5209_v44  ;;  %762 = vmatprep.mubr.f32.mxu1 %v3757_v40  ;;  %v3774_v47 = vsub.f32 %v2170_v14, %v2170_v14  ;;  %2884 = vmatprep.subr.bf16.mxu1 %v2883_v43  ;;  %v625_v15 = vsub.f32 %v3698_v10, %v5211_v52  ;;  %v5217_v24 = vand.u32 4294901760, %v3724_v55 }
  0x4b   :  { %v3776_v0 = vand.u32 4294901760, %v408_v39  ;;  %v632_v33 = vsub.f32 %v3716_v4, %v5216_v34  ;;  %2886 = vmatpush3.bf16.msra.mxu1 %v2885_v18  ;;  %v5218_v49 = vand.u32 4294901760, %v3765_v32  ;;  %v738_v9 = vand.u32 4294901760, %v737_v38 }
  0x4c   :  { %v745_v61 = vand.u32 4294901760, %v744_v31  ;;  %v626_v14 = vand.u32 4294901760, %v625_v15  ;;  %v5219_v40 = vand.u32 4294901760, %v3732_v35  ;;  %v638_v18 = vand.u32 4294901760, %v3754_v5 }
  0x4d   :  { %5380 = vst [vmem:[#allocation12_spill] sm:$0xff] %v3776_v0  ;;  %v3786_v44 = vsub.f32 %v408_v39, %v3776_v0  ;;  %v633_v43 = vand.u32 4294901760, %v632_v33  ;;  %v524_v52 = vsub.f32 %v3765_v32, %v5218_v49  ;;  %v751_v39 = vsub.f32 %v3724_v55, %v5217_v24 }
  0x4e   :  { %v2887_v51 = vpack.c.bf16 %v745_v61, %v738_v9  ;;  %v645_v31 = vand.u32 4294901760, %v3774_v47  ;;  %v758_v33 = vsub.f32 %v3732_v35, %v5219_v40  ;;  %v639_v9 = vsub.f32 %v3754_v5, %v638_v18 }
  0x4f   :  { %v5223_v34 = vand.u32 4294901760, %v3786_v44  ;;  %v2889_v38 = vpack.c.bf16 %v633_v43, %v626_v14  ;;  %v525_v15 = vand.u32 4294901760, %v524_v52  ;;  %v752_v14 = vand.u32 4294901760, %v751_v39 }
  0x50   :  { %2888 = vmatprep.subr.bf16.mxu1 %v2887_v51  ;;  %v646_v43 = vsub.f32 %v3774_v47, %v645_v31  ;;  %v2897_v24 = vpack.c.bf16 %v3332_v30, %v3323_v29  ;;  %v759_v52 = vand.u32 4294901760, %v758_v33  ;;  %v640_v51 = vand.u32 4294901760, %v639_v9 }
  0x51   :  { %v530_v61 = vsub.f32 %v3786_v44, %v5223_v34  ;;  %2890 = vmatpush3.bf16.msra.mxu1 %v2889_v38  ;;  %526 = vmatprep.mubr.f32.mxu0 %v525_v15  ;;  %v2899_v40 = vpack.c.bf16 %v3381_v45, %v3366_v41  ;;  %v2901_v34 = vpack.c.bf16 %v3404_v54, %v3402_v53  ;;  %v5381_v15 = vand.u32 4294901760, %v3286_v21 }
  0x52   :  { %v647_v26 = vand.u32 4294901760, %v646_v43  ;;  %v2891_v5 = vpack.c.bf16 %v759_v52, %v752_v14  ;;  %v2903_v39 = vpack.c.bf16 %v3432_v63, %v3430_v62  ;;  %v5382_v33 = vand.u32 4294901760, %v3297_v25 }
  0x53   :  { %v531_v49 = vand.u32 4294901760, %v530_v61  ;;  %v5383_v61 = vand.u32 4294901760, %v3323_v29  ;;  %v5384_v14 = vand.u32 4294901760, %v3332_v30  ;;  %v5385_v43 = vand.u32 4294901760, %v3366_v41 }
  0x54   :  { %v2893_v38 = vpack.c.bf16 %v647_v26, %v640_v51  ;;  %2892 = vmatprep.subr.bf16.mxu1 %v2891_v5  ;;  %v3819_v9 = vpack.c.bf16 %v5382_v33, %v5381_v15  ;;  %v5386_v26 = vand.u32 4294901760, %v3381_v45  ;;  %v5387_v21 = vand.u32 4294901760, %v3402_v53 }
  0x55   :  { %532 = vmatmul.mubr.f32.vlgmr.msra.gmra.mrb[0].mxu0 %v531_v49  ;;  %v3825_v49 = vpack.c.bf16 %v5384_v14, %v5383_v61  ;;  %v5389_v29 = vand.u32 4294901760, %v3430_v62  ;;  %v5390_v30 = vand.u32 4294901760, %v3432_v63  ;;  %v5391_v41 = vand.u32 4294901760, %v3476_v17 }
  0x56   :  { %2898 = vmatpush3.bf16.msra.mxu0 %v2897_v24  ;;  %v3831_v52 = vpack.c.bf16 %v5386_v26, %v5385_v43  ;;  %2894 = vmatpush3.bf16.msra.mxu1 %v2893_v38  ;;  %v5388_v24 = vand.u32 4294901760, %v3404_v54  ;;  %v5392_v45 = vand.u32 4294901760, %v3487_v23  ;;  %v5394_v53 = vand.u32 4294901760, %v3497_v36 }
  0x57   :  { %2900 = vmatprep.subr.bf16.mxu0 %v2899_v40  ;;  %v3843_v5 = vpack.c.bf16 %v5390_v30, %v5389_v29  ;;  %v5393_v40 = vmov 1.0|1.0   ;;  %899 = vmatprep.mubr.f32.mxu0 %v3765_v32  ;;  %v5395_v54 = vand.u32 4294901760, %v3514_v42  ;;  %v5396_v63 = vand.u32 4294901760, %v3539_v56 }
  0x58   :  { %v3837_v25 = vpack.c.bf16 %v5388_v24, %v5387_v21  ;;  %v3849_v51 = vpack.c.bf16 %v5392_v45, %v5391_v41  ;;  %2928 = vmatprep.subr.msk.bf16.mxu1 %vm3282_vm0, %v5393_v40  ;;  %v5397_v38 = vand.u32 4294901760, %v3550_v2  ;;  %v5398_v33 = vand.u32 4294901760, %v3564_v11 }
  0x59   :  { %v3859_v62 = vpack.c.bf16 %v5395_v54, %v5394_v53  ;;  %v5399_v61 = vand.u32 4294901760, %v3572_v19  ;;  %v64_v43 = vadd.s32 384, %v3234_v1  ;;  %v5400_v26 = vand.u32 4294901760, %v3594_v57  ;;  %764 = vmatmul.mubr.f32.vlgmr.msra.gmra.mrb[0].mxu1 %v3776_v0 }
  0x5a   :  { %v3865_v15 = vpack.c.bf16 %v5397_v38, %v5396_v63  ;;  %v5401_v21 = vand.u32 4294901760, %v3598_v13  ;;  %v5402_v29 = vand.u32 4294901760, %v3630_v48  ;;  %v5403_v30 = vand.u32 4294901760, %v3632_v59  ;;  %2902 = vmatpush3.bf16.msra.mxu0 %v2901_v34  ;;  %2930 = vmatpush3.bf16.msk.msra.mxu1 %vm3319_vm10, %v5393_v40 }
  0x5b   :  { %v3871_v14 = vpack.c.bf16 %v5399_v61, %v5398_v33  ;;  %v5404_v45 = vand.u32 4294901760, %v3643_v16  ;;  %v5405_v53 = vand.u32 4294901760, %v3658_v6  ;;  %v5406_v63 = vand.u32 4294901760, %v3666_v3  ;;  %2904 = vmatprep.subr.bf16.mxu0 %v2903_v39  ;;  %2932 = vmatprep.subr.msk.bf16.mxu1 %vm3352_vm4, %v5393_v40 }
  0x5c   :  { %v3878_v24 = vpack.c.bf16 %v5401_v21, %v5400_v26  ;;  %v3884_v41 = vpack.c.bf16 %v5403_v30, %v5402_v29  ;;  %v5407_v38 = vand.u32 4294901760, %v3675_v22  ;;  %v2905_v61 = vpack.c.bf16 %v3487_v23, %v3476_v17 }
  0x5d   :  { %v3890_v54 = vpack.c.bf16 %v5405_v53, %v5404_v45  ;;  %v5408_v26 = vand.u32 4294901760, %v3698_v10  ;;  %v5409_v21 = vand.u32 4294901760, %v3716_v4  ;;  %v3907_v30 = vpack.c.bf16 %v645_v31, %v638_v18 }
  0x5e   :  { %v3896_v33 = vpack.c.bf16 %v5407_v38, %v5406_v63  ;;  %v65_v45 = vadd.s32 392, %v3234_v1  ;;  %v2907_v17 = vpack.c.bf16 %v3514_v42, %v3497_v36  ;;  %v48_v23 = vadd.s32 256, %v3234_v1  ;;  %2906 = vmatpush3.bf16.msra.mxu0 %v2905_v61  ;;  %2934 = vmatpush3.bf16.msk.msra.mxu1 %vm3391_vm5, %v5393_v40 }
  0x5f   :  { %v3905_v29 = vpack.c.bf16 %v5409_v21, %v5408_v26  ;;  %v5410_v34 = vand.u32 4294901760, %v3765_v32  ;;  %vm131_vm13 = vcmp.ge.s32.totalorder %v64_v43, %v3244_v7  ;;  %vm196_vm12 = vcmp.lt.s32.totalorder %v64_v43, %v3254_v12  ;;  %2936 = vmatprep.subr.msk.bf16.mxu1 %vm3419_vm14, %v5393_v40 }
  0x60   :  { %v49_v18 = vadd.s32 264, %v3234_v1  ;;  %v2909_v31 = vpack.c.bf16 %v3550_v2, %v3539_v56  ;;  %vm132_vm11 = vcmp.ge.s32.totalorder %v65_v45, %v3244_v7  ;;  %vm197_vm15 = vcmp.lt.s32.totalorder %v65_v45, %v3254_v12  ;;  %2908 = vmatprep.subr.bf16.mxu0 %v2907_v17  ;;  %vm3938_vm7 = vmand %vm131_vm13, %vm196_vm12 }
  0x61   :  { %1006 = vmatprep.mubr.f32.mxu1 %v5410_v34  ;;  %v2911_v36 = vpack.c.bf16 %v3572_v19, %v3564_v11  ;;  %vm115_vm3 = vcmp.ge.s32.totalorder %v48_v23, %v3244_v7  ;;  %vm180_vm1 = vcmp.lt.s32.totalorder %v48_v23, %v3254_v12  ;;  %v5411_v42 = vmov 0  ;;  %vm3943_vm4 = vmand %vm132_vm11, %vm197_vm15  ;;  %v5429_v34 = vld [vmem:[#allocation10_spill] sm:$0xff] }
  0x62   :  { %v5412_v42 = vsel %vm3938_vm7, 4294967295, %v5411_v42  ;;  %v66_v56 = vadd.s32 400, %v3234_v1  ;;  %v5413_v2 = vmov 0  ;;  %vm116_vm5 = vcmp.ge.s32.totalorder %v49_v18, %v3244_v7  ;;  %2910 = vmatpush3.bf16.msra.mxu0 %v2909_v31  ;;  %vm3952_vm13 = vmand %vm115_vm3, %vm180_vm1  ;;  %2938 = vmatpush3.bf16.msk.msra.mxu1 %vm3455_vm9, %v5393_v40 }
  0x63   :  { %v5414_v2 = vsel %vm3943_vm4, 4294967295, %v5413_v2  ;;  %vm181_vm10 = vcmp.lt.s32.totalorder %v49_v18, %v3254_v12  ;;  %v67_v11 = vadd.s32 408, %v3234_v1  ;;  %v2913_v19 = vpack.c.bf16 %v3598_v13, %v3594_v57  ;;  %2912 = vmatprep.subr.bf16.mxu0 %v2911_v36 }
  0x64   :  { %v5415_v32 = vmov 0  ;;  %v2915_v39 = vpack.c.bf16 %v3632_v59, %v3630_v48  ;;  %v5417_v43 = vmov 0.0   ;;  %vm5418_vm12 = vnez %v5351_v27  ;;  %vm3970_vm11 = vmand %vm116_vm5, %vm181_vm10 }
  0x65   :  { %v5416_v32 = vsel %vm3952_vm13, 4294967295, %v5415_v32  ;;  %v2203_v53 = vsel %vm3938_vm7, 1.0, %v5417_v43  ;;  %2940 = vmatprep.subr.msk.bf16.mxu1 %vm5418_vm12, %v5393_v40  ;;  %v2204_v57 = vsel %vm3943_vm4, 1.0, %v5417_v43  ;;  %v5419_v13 = vmov 0 }
  0x66   :  { %v5420_v13 = vsel %vm3970_vm11, 4294967295, %v5419_v13  ;;  %vm133_vm15 = vcmp.ge.s32.totalorder %v66_v56, %v3244_v7  ;;  %vm198_vm3 = vcmp.lt.s32.totalorder %v66_v56, %v3254_v12  ;;  %v50_v48 = vadd.s32 272, %v3234_v1  ;;  %2914 = vmatpush3.bf16.msra.mxu0 %v2913_v19  ;;  %v5431_v56 = vld [vmem:[#allocation2_spill] sm:$0xff] }
  0x67   :  { %v2187_v59 = vsel %vm3952_vm13, 1.0, %v5417_v43  ;;  %vm134_vm1 = vcmp.ge.s32.totalorder %v67_v11, %v3244_v7  ;;  %vm199_vm7 = vcmp.lt.s32.totalorder %v67_v11, %v3254_v12  ;;  %v51_v63 = vadd.s32 280, %v3234_v1  ;;  %2916 = vmatprep.subr.bf16.mxu0 %v2915_v39  ;;  %vm4004_vm5 = vmand %vm133_vm15, %vm198_vm3 }
  0x68   :  { %v2917_v38 = vpack.c.bf16 %v3658_v6, %v3643_v16  ;;  %v2919_v61 = vpack.c.bf16 %v3675_v22, %v3666_v3  ;;  %v68_v26 = vadd.s32 416, %v3234_v1  ;;  %vm5421_vm10 = vnez %v5353_v46  ;;  %vm4017_vm13 = vmand %vm134_vm1, %vm199_vm7 }
  0x69   :  { %2942 = vmatpush3.bf16.msk.msra.mxu1 %vm5421_vm10, %v5393_v40  ;;  %v2921_v21 = vpack.c.bf16 %v3716_v4, %v3698_v10  ;;  %v3993_v45 = vsub.f32 %v2203_v53, %v2203_v53  ;;  %v3995_v17 = vsub.f32 %v2204_v57, %v2204_v57  ;;  %v2188_v16 = vsel %vm3970_vm11, 1.0, %v5417_v43  ;;  %v5436_v53 = vld [vmem:[#allocation3_spill] sm:$0xff] }
  0x6a   :  { %v5424_v6 = vmov 0  ;;  %2944 = vmatprep.subr.msk.bf16.mxu1 %vm3542_vm8, %v5393_v40  ;;  %v4011_v3 = vsub.f32 %v2187_v59, %v2187_v59  ;;  %v5427_v22 = vmov 0  ;;  %vm117_vm11 = vcmp.ge.s32.totalorder %v50_v48, %v3244_v7  ;;  %2918 = vmatpush3.bf16.msra.mxu0 %v2917_v38 }
  0x6b   :  { %5422 = vst [vmem:[#allocation13_spill] sm:$0xff] %v3993_v45  ;;  %5423 = vst [vmem:[#allocation14_spill] sm:$0xff] %v3995_v17  ;;  %v5425_v6 = vsel %vm4004_vm5, 4294967295, %v5424_v6  ;;  %v5428_v22 = vsel %vm4017_vm13, 4294967295, %v5427_v22  ;;  %vm182_vm15 = vcmp.lt.s32.totalorder %v50_v48, %v3254_v12  ;;  %v69_v10 = vadd.s32 424, %v3234_v1  ;;  %2920 = vmatprep.subr.bf16.mxu0 %v2919_v61 }
  0x6c   :  { %5426 = vst [vmem:[#allocation15_spill] sm:$0xff] %v4011_v3  ;;  %v2923_v4 = vpack.c.bf16 %v3732_v35, %v3724_v55  ;;  %v52_v23 = vadd.s32 288, %v3234_v1  ;;  %v2925_v18 = vpack.c.bf16 %v3774_v47, %v5429_v34  ;;  %v4031_v31 = vsub.f32 %v2188_v16, %v2188_v16  ;;  %vm4045_vm3 = vmand %vm117_vm11, %vm182_vm15 }
  0x6d   :  { %v2205_v36 = vsel %vm4004_vm5, 1.0, %v5417_v43  ;;  %vm5432_vm1 = vnez %v5431_v56  ;;  %v2206_v11 = vsel %vm4017_vm13, 1.0, %v5417_v43  ;;  %v5433_v47 = vmov 0 }
  0x6e   :  { %5430 = vst [vmem:[#allocation10_spill] sm:$0xff] %v4031_v31  ;;  %2946 = vmatpush3.bf16.msk.msra.mxu1 %vm5432_vm1, %v5393_v40  ;;  %v5434_v47 = vsel %vm4045_vm3, 4294967295, %v5433_v47  ;;  %v5237_v19 = vand.u32 4294901760, %v3993_v45  ;;  %v5236_v39 = vand.u32 4294901760, %v3995_v17  ;;  %vm5437_vm7 = vnez %v5436_v53  ;;  %2922 = vmatpush3.bf16.msra.mxu0 %v2921_v21  ;;  %v5452_v21 = vld [vmem:[#allocation4_spill] sm:$0xff] }
  0x6f   :  { %5435 = vst [vmem:[#allocation2_spill] sm:$0xff] %v5434_v47  ;;  %2948 = vmatprep.subr.msk.bf16.mxu1 %vm5437_vm7, %v5393_v40  ;;  %v5438_v57 = vand.u32 4294901760, %v3724_v55  ;;  %v5439_v59 = vand.u32 4294901760, %v3732_v35  ;;  %vm5440_vm11 = vcmp.lt.s32.totalorder %v51_v63, %v3254_v12  ;;  %vm5441_vm15 = vcmp.ge.s32.totalorder %v51_v63, %v3244_v7  ;;  %2924 = vmatprep.subr.bf16.mxu0 %v2923_v4  ;;  %v5454_v4 = vld [vmem:[#allocation5_spill] sm:$0xff] }
  0x70   :  { %vm4065_vm13 = vmand %vm5441_vm15, %vm5440_vm11  ;;  %v5442_v48 = vmov 0  ;;  %v53_v61 = vadd.s32 296, %v3234_v1  ;;  %v4072_v34 = vsub.f32 %v2205_v36, %v2205_v36  ;;  %v70_v55 = vadd.s32 432, %v3234_v1 }
  0x71   :  { %v4059_v38 = vpack.c.bf16 %v5439_v59, %v5438_v57  ;;  %v5443_v48 = vsel %vm4065_vm13, 4294967295, %v5442_v48  ;;  %v4077_v35 = vsub.f32 %v2206_v11, %v2206_v11  ;;  %v2189_v63 = vsel %vm4045_vm3, 1.0, %v5417_v43 }
  0x72   :  { %5444 = vst [vmem:[#allocation3_spill] sm:$0xff] %v5443_v48  ;;  %5445 = vst [vmem:[#allocation16_spill] sm:$0xff] %v4072_v34  ;;  %vm5447_vm11 = vcmp.lt.s32.totalorder %v68_v26, %v3254_v12  ;;  %vm5448_vm15 = vcmp.ge.s32.totalorder %v68_v26, %v3244_v7  ;;  %v5449_v36 = vmov 0  ;;  %v71_v57 = vadd.s32 440, %v3234_v1  ;;  %2926 = vmatpush3.bf16.msra.mxu0 %v2925_v18  ;;  %v5467_v18 = vld [vmem:[#allocation6_spill] sm:$0xff] }
  0x73   :  { %5446 = vst [vmem:[#allocation17_spill] sm:$0xff] %v4077_v35  ;;  %vm4086_vm4 = vmand %vm5448_vm15, %vm5447_vm11  ;;  %vm5453_vm7 = vnez %v5452_v21  ;;  %v2190_v11 = vsel %vm4065_vm13, 1.0, %v5417_v43  ;;  %v1515_v26 = vsub.f32 %v3993_v45, %v5237_v19  ;;  %v1522_v59 = vsub.f32 %v3995_v17, %v5236_v39  ;;  %2960 = vmatprep.subr.bf16.mxu0 %v3819_v9 }
  0x74   :  { %v5450_v36 = vsel %vm4086_vm4, 4294967295, %v5449_v36  ;;  %2950 = vmatpush3.bf16.msk.msra.mxu1 %vm5453_vm7, %v5393_v40  ;;  %vm5455_vm11 = vnez %v5454_v4  ;;  %vm5456_vm15 = vcmp.lt.s32.totalorder %v69_v10, %v3254_v12  ;;  %vm5457_vm5 = vcmp.ge.s32.totalorder %v69_v10, %v3244_v7 }
  0x75   :  { %5451 = vst [vmem:[#allocation18_spill] sm:$0xff] %v5450_v36  ;;  %2952 = vmatprep.subr.msk.bf16.mxu1 %vm5455_vm11, %v5393_v40  ;;  %vm4112_vm3 = vmand %vm5457_vm5, %vm5456_vm15  ;;  %v5458_v48 = vmov 0  ;;  %v5461_v39 = vand.u32 4294901760, %v4011_v3  ;;  %v54_v16 = vadd.s32 304, %v3234_v1  ;;  %v4124_v17 = vsub.f32 %v2189_v63, %v2189_v63  ;;  %902 = vmatmul.mubr.f32.vlgmr.msra.gmra.mrb[2].mxu0 %v3786_v44 }
  0x76   :  { %v5459_v48 = vsel %vm4112_vm3, 4294967295, %v5458_v48  ;;  %v2207_v10 = vsel %vm4086_vm4, 1.0, %v5417_v43  ;;  %v4131_v45 = vsub.f32 %v2190_v11, %v2190_v11  ;;  %vm5462_vm13 = vcmp.lt.s32.totalorder %v52_v23, %v3254_v12  ;;  %2962 = vmatpush3.bf16.msra.mxu0 %v3825_v49 }
  0x77   :  { %5460 = vst [vmem:[#allocation4_spill] sm:$0xff] %v5459_v48  ;;  %v4121_v19 = vsub.f32 %v4011_v3, %v5461_v39  ;;  %vm5463_vm7 = vcmp.ge.s32.totalorder %v52_v23, %v3244_v7  ;;  %v5464_v39 = vmov 0  ;;  %v55_v63 = vadd.s32 312, %v3234_v1  ;;  %2964 = vmatprep.subr.bf16.mxu0 %v3831_v52 }
  0x78   :  { %vm4137_vm11 = vmand %vm5463_vm7, %vm5462_vm13  ;;  %vm5468_vm5 = vnez %v5467_v18  ;;  %v2208_v23 = vsel %vm4112_vm3, 1.0, %v5417_v43  ;;  %vm5469_vm13 = vcmp.lt.s32.totalorder %v53_v61, %v3254_v12  ;;  %vm5470_vm7 = vcmp.ge.s32.totalorder %v53_v61, %v3244_v7 }
  0x79   :  { %v5465_v39 = vsel %vm4137_vm11, 4294967295, %v5464_v39  ;;  %2954 = vmatpush3.bf16.msk.msra.mxu1 %vm5468_vm5, %v5393_v40  ;;  %vm4155_vm15 = vmand %vm5470_vm7, %vm5469_vm13  ;;  %v1516_v3 = vand.u32 4294901760, %v1515_v26  ;;  %v1523_v36 = vand.u32 4294901760, %v1522_v59  ;;  %v5473_v9 = vand.u32 4294901760, %v4031_v31 }
  0x7a   :  { %5466 = vst [vmem:[#allocation5_spill] sm:$0xff] %v5465_v39  ;;  %2956 = vmatprep.subr.msk.bf16.mxu1 %vm3707_vm6, %v5393_v40  ;;  %v4165_v48 = vsub.f32 %v2207_v10, %v2207_v10  ;;  %v1404_v18 = vand.u32 4294901760, %v4121_v19  ;;  %vm5475_vm1 = vcmp.lt.s32.totalorder %v70_v55, %v3254_v12  ;;  %vm5476_vm13 = vcmp.ge.s32.totalorder %v70_v55, %v3244_v7 }
  0x7b   :  { %v1410_v47 = vsub.f32 %v4031_v31, %v5473_v9  ;;  %vm4172_vm7 = vmand %vm5476_vm13, %vm5475_vm1  ;;  %v5477_v61 = vmov 0  ;;  %vm121_vm8 = vcmp.ge.s32.totalorder %v54_v16, %v3244_v7  ;;  %vm186_vm3 = vcmp.lt.s32.totalorder %v54_v16, %v3254_v12  ;;  %v5485_v9 = vld [vmem:[#allocation11_spill] sm:$0xff]  ;;  %2966 = vmatpush3.bf16.msra.mxu0 %v3837_v25 }
  0x7c   :  { %v5478_v61 = vsel %vm4172_vm7, 4294967295, %v5477_v61  ;;  %v2191_v26 = vsel %vm4137_vm11, 1.0, %v5417_v43  ;;  %vm5480_vm4 = vcmp.lt.s32.totalorder %v71_v57, %v3254_v12  ;;  %vm5481_vm6 = vcmp.ge.s32.totalorder %v71_v57, %v3244_v7  ;;  %1176 = vmatprep.mubr.f32.mxu0 %v5485_v9  ;;  %2968 = vmatprep.subr.bf16.mxu0 %v3843_v5  ;;  %v5590_v55 = vld [vmem:[#allocation18_spill] sm:$0xff] }
  0x7d   :  { %5479 = vst [vmem:[#allocation19_spill] sm:$0xff] %v5478_v61  ;;  %vm4186_vm5 = vmand %vm5481_vm6, %vm5480_vm4  ;;  %v5482_v19 = vmov 0  ;;  %v72_v10 = vadd.s32 448, %v3234_v1  ;;  %vm122_vm1 = vcmp.ge.s32.totalorder %v55_v63, %v3244_v7  ;;  %vm187_vm13 = vcmp.lt.s32.totalorder %v55_v63, %v3254_v12  ;;  %2958 = vmatpush3.bf16.msk.msra.mxu1 %vm3734_vm2, %v5393_v40 }
  0x7e   :  { %v5483_v19 = vsel %vm4186_vm5, 4294967295, %v5482_v19  ;;  %v4203_v59 = vsub.f32 %v2208_v23, %v2208_v23  ;;  %v2192_v49 = vsel %vm4155_vm15, 1.0, %v5417_v43  ;;  %v4208_v39 = vpack.c.bf16 %v1523_v36, %v1516_v3  ;;  %vm4214_vm4 = vmand %vm121_vm8, %vm186_vm3  ;;  %2992 = vmatprep.subr.msk.bf16.mxu1 %vm3282_vm0, %v5393_v40 }
  0x7f   :  { %5484 = vst [vmem:[#allocation20_spill] sm:$0xff] %v5483_v19  ;;  %v1411_v0 = vand.u32 4294901760, %v1410_v47  ;;  %v5488_v31 = vmov 0  ;;  %v4221_v52 = vsub.f32 %v2191_v26, %v2191_v26  ;;  %v2209_v3 = vsel %vm4172_vm7, 1.0, %v5417_v43  ;;  %vm4234_vm8 = vmand %vm122_vm1, %vm187_vm13  ;;  %2970 = vmatpush3.bf16.msra.mxu0 %v3849_v51 }
  0x80   :  { %5487 = vst [vmem:[#allocation11_spill] sm:$0xff] %v4203_v59  ;;  %v5489_v31 = vsel %vm4214_vm4, 4294967295, %v5488_v31  ;;  %v2210_v47 = vsel %vm4186_vm5, 1.0, %v5417_v43  ;;  %v73_v16 = vadd.s32 456, %v3234_v1  ;;  %v5490_v36 = vmov 0  ;;  %2972 = vmatprep.subr.bf16.mxu0 %v3859_v62 }
  0x81   :  { %v5491_v36 = vsel %vm4234_vm8, 4294967295, %v5490_v36  ;;  %v5492_v20 = vand.u32 4294901760, %v4072_v34  ;;  %v5493_v26 = vand.u32 4294901760, %v4077_v35  ;;  %vm139_vm0 = vcmp.ge.s32.totalorder %v72_v10, %v3244_v7 }
  0x82   :  { %vm204_vm6 = vcmp.lt.s32.totalorder %v72_v10, %v3254_v12  ;;  %v5494_v63 = vand.u32 4294901760, %v3786_v44  ;;  %v4253_v19 = vsub.f32 %v2192_v49, %v2192_v49  ;;  %vm5498_vm3 = vnez %v5336_v28 }
  0x83   :  { %v4241_v23 = vsub.f32 %v4072_v34, %v5492_v20  ;;  %v4246_v57 = vsub.f32 %v4077_v35, %v5493_v26  ;;  %v2193_v20 = vsel %vm4214_vm4, 1.0, %v5417_v43  ;;  %v5496_v34 = vand.u32 4294901760, %v4124_v17  ;;  %vm4292_vm4 = vmand %vm139_vm0, %vm204_vm6  ;;  %2974 = vmatpush3.bf16.msra.mxu0 %v3865_v15 }
  0x84   :  { %1010 = vmatmul.mubr.f32.vlgmr.msra.gmra.mrb[2].mxu1 %v5494_v63  ;;  %5495 = vst [vmem:[#allocation9_spill] sm:$0xff] %v4253_v19  ;;  %v5497_v35 = vand.u32 4294901760, %v4131_v45  ;;  %v4272_v44 = vpack.c.bf16 %v1411_v0, %v1404_v18  ;;  %v4274_v25 = vsub.f32 %v2209_v3, %v2209_v3  ;;  %v4276_v49 = vsub.f32 %v2210_v47, %v2210_v47 }
  0x85   :  { %v4261_v26 = vsub.f32 %v4124_v17, %v5496_v34  ;;  %2994 = vmatpush3.bf16.msk.msra.mxu1 %vm5498_vm3, %v5393_v40  ;;  %v56_v34 = vadd.s32 320, %v3234_v1  ;;  %vm5501_vm1 = vnez %v5338_v37  ;;  %1280 = vmatprep.mubr.f32.mxu1 %v5485_v9  ;;  %v2194_v5 = vsel %vm4234_vm8, 1.0, %v5417_v43 }
  0x86   :  { %v4266_v61 = vsub.f32 %v4131_v45, %v5497_v35  ;;  %5499 = vst [vmem:[#allocation21_spill] sm:$0xff] %v4274_v25  ;;  %5500 = vst [vmem:[#allocation22_spill] sm:$0xff] %v4276_v49  ;;  %2996 = vmatprep.subr.msk.bf16.mxu1 %vm5501_vm1, %v5393_v40  ;;  %vm140_vm13 = vcmp.ge.s32.totalorder %v73_v16, %v3244_v7  ;;  %vm205_vm3 = vcmp.lt.s32.totalorder %v73_v16, %v3254_v12  ;;  %v5502_v28 = vmov 0 }
  0x87   :  { %v5503_v28 = vsel %vm4292_vm4, 4294967295, %v5502_v28  ;;  %v57_v37 = vadd.s32 328, %v3234_v1  ;;  %v4297_v0 = vsub.f32 %v2193_v20, %v2193_v20  ;;  %v1530_v35 = vand.u32 4294901760, %v4241_v23  ;;  %vm4313_vm6 = vmand %vm140_vm13, %vm205_vm3  ;;  %2976 = vmatprep.subr.bf16.mxu0 %v3871_v14 }
  0x88   :  { %v1537_v18 = vand.u32 4294901760, %v4246_v57  ;;  %v74_v9 = vadd.s32 464, %v3234_v1  ;;  %v1418_v3 = vand.u32 4294901760, %v4261_v26  ;;  %v1425_v10 = vand.u32 4294901760, %v4266_v61  ;;  %2978 = vmatpush3.bf16.msra.mxu0 %v3878_v24 }
  0x89   :  { %5504 = vst [vmem:[#allocation23_spill] sm:$0xff] %v4297_v0  ;;  %v5265_v47 = vand.u32 4294901760, %v4165_v48  ;;  %v75_v63 = vadd.s32 472, %v3234_v1  ;;  %vm5505_vm0 = vnez %v5342_v50  ;;  %v5506_v57 = vmov 0  ;;  %2980 = vmatprep.subr.bf16.mxu0 %v3884_v41 }
  0x8a   :  { %2998 = vmatpush3.bf16.msk.msra.mxu1 %vm5505_vm0, %v5393_v40  ;;  %v5507_v57 = vsel %vm4313_vm6, 4294967295, %v5506_v57  ;;  %v2211_v51 = vsel %vm4292_vm4, 1.0, %v5417_v43  ;;  %vm123_vm1 = vcmp.ge.s32.totalorder %v56_v34, %v3244_v7  ;;  %vm188_vm8 = vcmp.lt.s32.totalorder %v56_v34, %v3254_v12 }
  0x8b   :  { %v58_v62 = vadd.s32 336, %v3234_v1  ;;  %3000 = vmatprep.subr.msk.bf16.mxu1 %vm3419_vm14, %v5393_v40  ;;  %v5266_v50 = vand.u32 4294901760, %v4203_v59  ;;  %v59_v61 = vadd.s32 344, %v3234_v1  ;;  %v5268_v16 = vand.u32 4294901760, %v4221_v52  ;;  %vm4338_vm14 = vmand %vm123_vm1, %vm188_vm8 }
  0x8c   :  { %v5267_v23 = vand.u32 4294901760, %v4253_v19  ;;  %v2212_v60 = vsel %vm4313_vm6, 1.0, %v5417_v43  ;;  %v5508_v20 = vmov 0  ;;  %vm207_vm13 = vcmp.lt.s32.totalorder %v75_v63, %v3254_v12  ;;  %2982 = vmatpush3.bf16.msra.mxu0 %v3890_v54 }
  0x8d   :  { %v5509_v20 = vsel %vm4338_vm14, 4294967295, %v5508_v20  ;;  %vm5510_vm3 = vcmp.lt.s32.totalorder %v57_v37, %v3254_v12  ;;  %vm5511_vm4 = vcmp.ge.s32.totalorder %v57_v37, %v3244_v7  ;;  %v5512_v15 = vmov 0  ;;  %2984 = vmatprep.subr.bf16.mxu0 %v3896_v33 }
  0x8e   :  { %3002 = vmatpush3.bf16.msk.msra.mxu1 %vm3455_vm9, %v5393_v40  ;;  %vm4353_vm8 = vmand %vm5511_vm4, %vm5510_vm3  ;;  %v1543_v34 = vsub.f32 %v4165_v48, %v5265_v47  ;;  %v4366_v8 = vsub.f32 %v2194_v5, %v2194_v5  ;;  %v4368_v37 = vpack.c.bf16 %v1537_v18, %v1530_v35  ;;  %vm5515_vm9 = vcmp.lt.s32.totalorder %v74_v9, %v3254_v12 }
  0x8f   :  { %v5513_v15 = vsel %vm4353_vm8, 4294967295, %v5512_v15  ;;  %3004 = vmatprep.subr.msk.bf16.mxu1 %vm5418_vm12, %v5393_v40  ;;  %vm5516_vm4 = vcmp.ge.s32.totalorder %v74_v9, %v3244_v7  ;;  %v5517_v47 = vmov 0  ;;  %v2195_v27 = vsel %vm4338_vm14, 1.0, %v5417_v43 }
  0x90   :  { %5514 = vst [vmem:[#allocation24_spill] sm:$0xff] %v4366_v8  ;;  %vm4374_vm3 = vmand %vm5516_vm4, %vm5515_vm9  ;;  %v1550_v5 = vsub.f32 %v4203_v59, %v5266_v50  ;;  %v1431_v35 = vsub.f32 %v4221_v52, %v5268_v16  ;;  %v1438_v18 = vsub.f32 %v4253_v19, %v5267_v23  ;;  %vm5519_vm12 = vcmp.ge.s32.totalorder %v75_v63, %v3244_v7 }
  0x91   :  { %v5518_v47 = vsel %vm4374_vm3, 4294967295, %v5517_v47  ;;  %vm4396_vm9 = vmand %vm5519_vm12, %vm207_vm13  ;;  %v5520_v9 = vmov 0  ;;  %v4401_v14 = vpack.c.bf16 %v1425_v10, %v1418_v3  ;;  %v4403_v50 = vsub.f32 %v2211_v51, %v2211_v51  ;;  %2986 = vmatpush3.bf16.msra.mxu0 %v3905_v29 }
  0x92   :  { %v5521_v9 = vsel %vm4396_vm9, 4294967295, %v5520_v9  ;;  %v4405_v26 = vsub.f32 %v2212_v60, %v2212_v60  ;;  %vm5522_vm4 = vcmp.lt.s32.totalorder %v58_v62, %v3254_v12  ;;  %vm5523_vm1 = vcmp.ge.s32.totalorder %v58_v62, %v3244_v7  ;;  %3006 = vmatpush3.bf16.msk.msra.mxu1 %vm5421_vm10, %v5393_v40  ;;  %2988 = vmatprep.subr.bf16.mxu0 %v4059_v38 }
  0x93   :  { %vm4411_vm0 = vmand %vm5523_vm1, %vm5522_vm4  ;;  %v5524_v23 = vmov 0  ;;  %v5526_v63 = vand.u32 4294901760, %v4274_v25  ;;  %v1544_v24 = vand.u32 4294901760, %v1543_v34  ;;  %vm5527_vm13 = vcmp.lt.s32.totalorder %v59_v61, %v3254_v12 }
  0x94   :  { %v5525_v23 = vsel %vm4411_vm0, 4294967295, %v5524_v23  ;;  %vm5528_vm12 = vcmp.ge.s32.totalorder %v59_v61, %v3244_v7  ;;  %v5529_v3 = vmov 0  ;;  %v5531_v10 = vand.u32 4294901760, %v4276_v49 }
  0x95   :  { %v1557_v16 = vsub.f32 %v4274_v25, %v5526_v63  ;;  %vm4426_vm14 = vmand %vm5528_vm12, %vm5527_vm13  ;;  %v76_v41 = vadd.s32 480, %v3234_v1  ;;  %vm5532_vm10 = vnez %v5355_v58  ;;  %v2196_v46 = vsel %vm4353_vm8, 1.0, %v5417_v43  ;;  %2990 = vmatpush3.bf16.msra.mxu0 %v3907_v30  ;;  %v5559_v30 = vld [vmem:[#allocation6_spill] sm:$0xff] }
  0x96   :  { %v5530_v3 = vsel %vm4426_vm14, 4294967295, %v5529_v3  ;;  %v1564_v51 = vsub.f32 %v4276_v49, %v5531_v10  ;;  %3008 = vmatprep.subr.msk.bf16.mxu1 %vm5532_vm10, %v5393_v40  ;;  %v4441_v61 = vsub.f32 %v2195_v27, %v2195_v27  ;;  %v77_v34 = vadd.s32 488, %v3234_v1 }
  0x97   :  { %v1551_v63 = vand.u32 4294901760, %v1550_v5  ;;  %v1432_v10 = vand.u32 4294901760, %v1431_v35  ;;  %v1439_v49 = vand.u32 4294901760, %v1438_v18  ;;  %v2213_v62 = vsel %vm4374_vm3, 1.0, %v5417_v43 }
  0x98   :  { %v2214_v58 = vsel %vm4396_vm9, 1.0, %v5417_v43  ;;  %v2197_v27 = vsel %vm4411_vm0, 1.0, %v5417_v43  ;;  %v2198_v5 = vsel %vm4426_vm14, 1.0, %v5417_v43  ;;  %v1558_v35 = vand.u32 4294901760, %v1557_v16 }
  0x99   :  { %vm5533_vm1 = vnez %v5431_v56  ;;  %v1565_v54 = vand.u32 4294901760, %v1564_v51  ;;  %v5534_v18 = vand.u32 4294901760, %v4297_v0  ;;  %vm143_vm4 = vcmp.ge.s32.totalorder %v76_v41, %v3244_v7 }
  0x9a   :  { %3010 = vmatpush3.bf16.msk.msra.mxu1 %vm5533_vm1, %v5393_v40  ;;  %vm208_vm13 = vcmp.lt.s32.totalorder %v76_v41, %v3254_v12  ;;  %vm5535_vm12 = vnez %v5436_v53  ;;  %v5536_v33 = vand.u32 4294901760, %v4366_v8  ;;  %vm209_vm1 = vcmp.lt.s32.totalorder %v77_v34, %v3254_v12 }
  0x9b   :  { %v4465_v60 = vsub.f32 %v4297_v0, %v5534_v18  ;;  %3012 = vmatprep.subr.msk.bf16.mxu1 %vm5535_vm12, %v5393_v40  ;;  %v60_v56 = vadd.s32 352, %v3234_v1  ;;  %v4480_v51 = vsub.f32 %v2196_v46, %v2196_v46  ;;  %v4482_v18 = vpack.c.bf16 %v1551_v63, %v1544_v24  ;;  %vm4500_vm12 = vmand %vm143_vm4, %vm208_vm13  ;;  %v5574_v46 = vld [vmem:[#allocation12_spill] sm:$0xff] }
  0x9c   :  { %v4475_v16 = vsub.f32 %v4366_v8, %v5536_v33  ;;  %v4484_v0 = vpack.c.bf16 %v1439_v49, %v1432_v10  ;;  %v61_v53 = vadd.s32 360, %v3234_v1  ;;  %v4488_v25 = vsub.f32 %v2213_v62, %v2213_v62  ;;  %1178 = vmatmul.mubr.f32.vlgmr.msra.gmra.mrb[4].mxu0 %v5574_v46  ;;  %v5577_v49 = vld [vmem:[#allocation3_spill] sm:$0xff] }
  0x9d   :  { %v4490_v33 = vsub.f32 %v2214_v58, %v2214_v58  ;;  %v4492_v8 = vsub.f32 %v2197_v27, %v2197_v27  ;;  %v4494_v19 = vsub.f32 %v2198_v5, %v2198_v5  ;;  %v5537_v24 = vmov 0  ;;  %v5566_v27 = vld [vmem:[#allocation7_spill] sm:$0xff] }
  0x9e   :  { %v5538_v24 = vsel %vm4500_vm12, 4294967295, %v5537_v24  ;;  %vm5539_vm10 = vnez %v5452_v21  ;;  %v4508_v29 = vpack.c.bf16 %v1565_v54, %v1558_v35  ;;  %vm5540_vm14 = vcmp.ge.s32.totalorder %v77_v34, %v3244_v7  ;;  %v5573_v54 = vld [vmem:[#allocation8_spill] sm:$0xff] }
  0x9f   :  { %3014 = vmatpush3.bf16.msk.msra.mxu1 %vm5539_vm10, %v5393_v40  ;;  %vm4515_vm0 = vmand %vm5540_vm14, %vm209_vm1  ;;  %v5541_v62 = vmov 0  ;;  %v78_v41 = vadd.s32 496, %v3234_v1  ;;  %v79_v38 = vadd.s32 504, %v3234_v1  ;;  %vm5543_vm4 = vnez %v5412_v42 }
  0xa0   :  { %v5542_v62 = vsel %vm4515_vm0, 4294967295, %v5541_v62  ;;  %vm5544_vm13 = vnez %v5414_v2  ;;  %v5545_v21 = vmov 0  ;;  %vm5548_vm9 = vnez %v5454_v4 }
  0xa1   :  { %vm4525_vm10 = vmpackc.low %vm5544_vm13, %vm5543_vm4  ;;  %3016 = vmatprep.subr.msk.bf16.mxu1 %vm5548_vm9, %v5393_v40  ;;  %v5291_v34 = vand.u32 4294901760, %v4403_v50  ;;  %vm5549_vm3 = vnez %v5416_v32  ;;  %vm5550_vm8 = vnez %v5420_v13  ;;  %v5551_v42 = vmov 0 }
  0xa2   :  { %v5546_v21 = vsel %vm4525_vm10, 4294967295, %v5545_v21  ;;  %vm4540_vm4 = vmpackc.low %vm5550_vm8, %vm5549_vm3  ;;  %v2215_v2 = vsel %vm4500_vm12, 1.0, %v5417_v43  ;;  %v5290_v4 = vand.u32 4294901760, %v4405_v26  ;;  %vm5554_vm14 = vnez %v5425_v6  ;;  %3024 = vmatprep.subr.msk.bf16.mxu0 %vm4525_vm10, %v5393_v40 }
  0xa3   :  { %5547 = vst [vmem:[#allocation25_spill] sm:$0xff] %v5546_v21  ;;  %v5552_v42 = vsel %vm4540_vm4, 4294967295, %v5551_v42  ;;  %vm5555_vm1 = vnez %v5428_v22  ;;  %v5556_v32 = vmov 0  ;;  %v2216_v13 = vsel %vm4515_vm0, 1.0, %v5417_v43  ;;  %3026 = vmatpush3.bf16.msk.msra.mxu0 %vm4540_vm4, %v5393_v40 }
  0xa4   :  { %5553 = vst [vmem:[#allocation26_spill] sm:$0xff] %v5552_v42  ;;  %vm4555_vm8 = vmpackc.low %vm5555_vm1, %vm5554_vm14  ;;  %v419_v58 = vsub.s32 3, %v3234_v1  ;;  %vm5560_vm3 = vnez %v5559_v30  ;;  %vm5561_vm14 = vcmp.lt.s32.totalorder %v60_v56, %v3254_v12  ;;  %vm5562_vm1 = vcmp.ge.s32.totalorder %v60_v56, %v3244_v7 }
  0xa5   :  { %v5557_v32 = vsel %vm4555_vm8, 4294967295, %v5556_v32  ;;  %3018 = vmatpush3.bf16.msk.msra.mxu1 %vm5560_vm3, %v5393_v40  ;;  %vm4575_vm9 = vmand %vm5562_vm1, %vm5561_vm14  ;;  %v5563_v6 = vmov 0  ;;  %vm210_vm12 = vcmp.lt.s32.totalorder %v78_v41, %v3254_v12  ;;  %v62_v22 = vadd.s32 368, %v3234_v1  ;;  %3028 = vmatprep.subr.msk.bf16.mxu0 %vm4555_vm8, %v5393_v40 }
  0xa6   :  { %5558 = vst [vmem:[#allocation27_spill] sm:$0xff] %v5557_v32  ;;  %v5564_v6 = vsel %vm4575_vm9, 4294967295, %v5563_v6  ;;  %vm5567_vm10 = vnez %v5566_v27  ;;  %vm5568_vm3 = vcmp.lt.s32.totalorder %v61_v53, %v3254_v12  ;;  %vm5569_vm6 = vcmp.ge.s32.totalorder %v61_v53, %v3244_v7  ;;  %v5575_v27 = vld [vmem:[#allocation2_spill] sm:$0xff]  ;;  %v5592_v32 = vld [vmem:[#allocation4_spill] sm:$0xff] }
  0xa7   :  { %5565 = vst [vmem:[#allocation6_spill] sm:$0xff] %v5564_v6  ;;  %3020 = vmatprep.subr.msk.bf16.mxu1 %vm5567_vm10, %v5393_v40  ;;  %vm4590_vm14 = vmand %vm5569_vm6, %vm5568_vm3  ;;  %v5570_v5 = vmov 0  ;;  %vm211_vm1 = vcmp.lt.s32.totalorder %v79_v38, %v3254_v12  ;;  %v63_v35 = vadd.s32 376, %v3234_v1  ;;  %v420_v56 = vrot.slane %v5573_v54, %v419_v58 }
  0xa8   :  { %v5571_v5 = vsel %vm4590_vm14, 4294967295, %v5570_v5  ;;  %v415_v30 = vsub.s32 2, %v3234_v1  ;;  %vm5576_vm10 = vnez %v5575_v27  ;;  %vm5578_vm0 = vnez %v5577_v49 }
  0xa9   :  { %5572 = vst [vmem:[#allocation7_spill] sm:$0xff] %v5571_v5  ;;  %vm4603_vm13 = vmpackc.low %vm5578_vm0, %vm5576_vm10  ;;  %v5579_v53 = vmov 0  ;;  %v4607_v10 = vsub.f32 %v2215_v2, %v2215_v2  ;;  %v4609_v63 = vsub.f32 %v2216_v13, %v2216_v13  ;;  %v4614_v58 = vsub.f32 %v4403_v50, %v5291_v34  ;;  %3022 = vmatpush3.bf16.msk.msra.mxu1 %vm3734_vm2, %v5393_v40 }
  0xaa   :  { %v5580_v53 = vsel %vm4603_vm13, 4294967295, %v5579_v53  ;;  %v4619_v1 = vsub.f32 %v4405_v26, %v5290_v4  ;;  %v2199_v49 = vsel %vm4575_vm9, 1.0, %v5417_v43  ;;  %v5582_v2 = vand.u32 4294901760, %v4441_v61  ;;  %3056 = vmatprep.subr.bf16.mxu1 %v4208_v39  ;;  %vm4682_vm10 = vmpackc.low %vm4155_vm15, %vm4137_vm11  ;;  %3030 = vmatpush3.bf16.msk.msra.mxu0 %vm4603_vm13, %v5393_v40 }
  0xab   :  { %5581 = vst [vmem:[#allocation8_spill] sm:$0xff] %v5580_v53  ;;  %vm5583_vm6 = vcmp.ge.s32.totalorder %v78_v41, %v3244_v7  ;;  %v4641_v34 = vand.u32 4294901760, %v420_v56  ;;  %v2200_v41 = vsel %vm4590_vm14, 1.0, %v5417_v43  ;;  %vm5591_vm2 = vnez %v5590_v55 }
  0xac   :  { %v4630_v13 = vsub.f32 %v4441_v61, %v5582_v2  ;;  %vm4636_vm0 = vmand %vm5583_vm6, %vm210_vm12  ;;  %vm5587_vm12 = vcmp.ge.s32.totalorder %v79_v38, %v3244_v7  ;;  %vm194_vm6 = vcmp.lt.s32.totalorder %v62_v22, %v3254_v12  ;;  %vm5593_vm8 = vnez %v5592_v32  ;;  %1282 = vmatmul.mubr.f32.vlgmr.msra.gmra.mrb[4].mxu1 %v5574_v46 }
  0xad   :  { %5586 = vst [vmem:[#allocation12_spill] sm:$0xff] %v4641_v34  ;;  %vm4656_vm3 = vmand %vm5587_vm12, %vm211_vm1  ;;  %v5594_v42 = vmov 0  ;;  %vm130_vm1 = vcmp.ge.s32.totalorder %v63_v35, %v3244_v7  ;;  %vm195_vm12 = vcmp.lt.s32.totalorder %v63_v35, %v3254_v12  ;;  %v4675_v38 = vsub.f32 %v420_v56, %v4641_v34  ;;  %3058 = vmatpush3.bf16.msra.mxu1 %v4272_v44 }
  0xae   :  { %vm4667_vm4 = vmpackc.low %vm5593_vm8, %vm5591_vm2  ;;  %v416_v21 = vrot.slane %v5573_v54, %v415_v30  ;;  %v5598_v32 = vmov 0  ;;  %v4686_v55 = vsub.f32 %v2199_v49, %v2199_v49  ;;  %v1572_v39 = vand.u32 4294901760, %v4614_v58  ;;  %3060 = vmatprep.subr.bf16.mxu1 %v4368_v37  ;;  %1624 = vmatprep.mubr.f32.mxu1 %v4641_v34 }
  0xaf   :  { %v5595_v42 = vsel %vm4667_vm4, 4294967295, %v5594_v42  ;;  %v5599_v32 = vsel %vm4682_vm10, 4294967295, %v5598_v32  ;;  %v1579_v5 = vand.u32 4294901760, %v4619_v1  ;;  %v5602_v6 = vand.u32 4294901760, %v4480_v51  ;;  %3032 = vmatprep.subr.msk.bf16.mxu0 %vm4667_vm4, %v5393_v40  ;;  %vm4725_vm8 = vmand %vm130_vm1, %vm195_vm12 }
  0xb0   :  { %5596 = vst [vmem:[#allocation2_spill] sm:$0xff] %v5595_v42  ;;  %5600 = vst [vmem:[#allocation3_spill] sm:$0xff] %v5599_v32  ;;  %v2217_v11 = vsel %vm4636_vm0, 1.0, %v5417_v43  ;;  %v2218_v4 = vsel %vm4656_vm3, 1.0, %v5417_v43  ;;  %vm5603_vm11 = vcmp.ge.s32.totalorder %v62_v22, %v3244_v7  ;;  %v5606_v54 = vand.u32 4294901760, %v4488_v25  ;;  %3034 = vmatpush3.bf16.msk.msra.mxu0 %vm4682_vm10, %v5393_v40 }
  0xb1   :  { %5601 = vst [vmem:[#allocation18_spill] sm:$0xff] %v4686_v55  ;;  %v1466_v56 = vsub.f32 %v4480_v51, %v5602_v6  ;;  %vm4707_vm15 = vmand %vm5603_vm11, %vm194_vm6  ;;  %v4719_v58 = vsub.f32 %v2200_v41, %v2200_v41  ;;  %v5610_v1 = vand.u32 4294901760, %v4490_v33  ;;  %v5613_v12 = vmov 0  ;;  %3062 = vmatpush3.bf16.msra.mxu1 %v4401_v14 }
  0xb2   :  { %v1585_v46 = vsub.f32 %v4488_v25, %v5606_v54  ;;  %vm4738_vm6 = vmpackc.low %vm4186_vm5, %vm4172_vm7  ;;  %v5616_v7 = vand.u32 4294901760, %v4675_v38  ;;  %v4746_v41 = vand.u32 4294901760, %v416_v21  ;;  %v1460_v42 = vand.u32 4294901760, %v4630_v13  ;;  %3064 = vmatprep.subr.bf16.mxu1 %v4482_v18 }
  0xb3   :  { %5607 = vst [vmem:[#allocation4_spill] sm:$0xff] %v4719_v58  ;;  %v1592_v49 = vsub.f32 %v4490_v33, %v5610_v1  ;;  %v5614_v12 = vsel %vm4738_vm6, 4294967295, %v5613_v12  ;;  %v1467_v44 = vand.u32 4294901760, %v1466_v56  ;;  %v4752_v54 = vsub.f32 %v2217_v11, %v2217_v11  ;;  %3036 = vmatprep.subr.msk.bf16.mxu0 %vm4738_vm6, %v5393_v40 }
  0xb4   :  { %5615 = vst [vmem:[#allocation5_spill] sm:$0xff] %v5614_v12  ;;  %v1386_v35 = vsub.f32 %v4675_v38, %v5616_v7  ;;  %5617 = vst [vmem:[#allocation19_spill] sm:$0xff] %v4746_v41  ;;  %v4754_v53 = vsub.f32 %v2218_v4, %v2218_v4  ;;  %v2201_v37 = vsel %vm4707_vm15, 1.0, %v5417_v43  ;;  %v2202_v7 = vsel %vm4725_vm8, 1.0, %v5417_v43 }
  0xb5   :  { %5618 = vst [vmem:[#allocation20_spill] sm:$0xff] %v4752_v54  ;;  %v1586_v30 = vand.u32 4294901760, %v1585_v46  ;;  %vm5620_vm5 = vnez %v5489_v31  ;;  %vm5621_vm7 = vnez %v5491_v36  ;;  %v5622_v13 = vmov 0  ;;  %3066 = vmatpush3.bf16.msra.mxu1 %v4484_v0 }
  0xb6   :  { %5619 = vst [vmem:[#allocation28_spill] sm:$0xff] %v4754_v53  ;;  %v1387_v1 = vand.u32 4294901760, %v1386_v35  ;;  %vm4772_vm2 = vmpackc.low %vm5621_vm7, %vm5620_vm5  ;;  %v1593_v56 = vand.u32 4294901760, %v1592_v49  ;;  %v5625_v11 = vand.u32 4294901760, %v4492_v8  ;;  %v5626_v4 = vand.u32 4294901760, %v4494_v19  ;;  %3068 = vmatprep.subr.bf16.mxu1 %v4508_v29  ;;  %v5651_v29 = vld [vmem:[#allocation15_spill] sm:$0xff] }
  0xb7   :  { %v5623_v13 = vsel %vm4772_vm2, 4294967295, %v5622_v13  ;;  %v1486_v35 = vand.u32 4294901760, %v4686_v55  ;;  %vm5627_vm1 = vnez %v5503_v28  ;;  %vm5628_vm12 = vnez %v5507_v57  ;;  %3038 = vmatpush3.bf16.msk.msra.mxu0 %vm4772_vm2, %v5393_v40 }
  0xb8   :  { %5624 = vst [vmem:[#allocation29_spill] sm:$0xff] %v5623_v13  ;;  %v1473_v43 = vsub.f32 %v4492_v8, %v5625_v11  ;;  %v1480_v46 = vsub.f32 %v4494_v19, %v5626_v4  ;;  %vm4788_vm11 = vmpackc.low %vm5628_vm12, %vm5627_vm1  ;;  %v5629_v31 = vmov 0  ;;  %1388 = vmatprep.mubr.f32.mxu0 %v1387_v1  ;;  %v4794_v36 = vsub.f32 %v416_v21, %v4746_v41 }
  0xb9   :  { %v5630_v31 = vsel %vm4788_vm11, 4294967295, %v5629_v31  ;;  %v5632_v14 = vand.u32 4294901760, %v4607_v10  ;;  %v5633_v11 = vand.u32 4294901760, %v4609_v63  ;;  %v1493_v57 = vand.u32 4294901760, %v4719_v58  ;;  %3040 = vmatprep.subr.msk.bf16.mxu0 %vm4788_vm11, %v5393_v40 }
  0xba   :  { %5631 = vst [vmem:[#allocation30_spill] sm:$0xff] %v5630_v31  ;;  %v4803_v4 = vsub.f32 %v2201_v37, %v2201_v37  ;;  %v1612_v34 = vand.u32 4294901760, %v4752_v54  ;;  %v1619_v18 = vand.u32 4294901760, %v4754_v53  ;;  %v5634_v21 = vand.u32 4294901760, %v4465_v60 }
  0xbb   :  { %v1599_v49 = vsub.f32 %v4607_v10, %v5632_v14  ;;  %v1606_v28 = vsub.f32 %v4609_v63, %v5633_v11  ;;  %v5635_v1 = vand.u32 4294901760, %v4475_v16  ;;  %v3071_v12 = vpack.c.bf16 %v1579_v5, %v1572_v39 }
  0xbc   :  { %v3073_v32 = vpack.c.bf16 %v1467_v44, %v1460_v42  ;;  %v4814_v11 = vsub.f32 %v2202_v7, %v2202_v7  ;;  %vm5636_vm5 = vnez %v5509_v20  ;;  %vm5637_vm7 = vnez %v5513_v15 }
  0xbd   :  { %v3069_v14 = vpack.c.bf16 %v5635_v1, %v5634_v21  ;;  %vm4823_vm1 = vmpackc.low %vm5637_vm7, %vm5636_vm5  ;;  %v5638_v37 = vmov 0  ;;  %v3075_v60 = vpack.c.bf16 %v1593_v56, %v1586_v30  ;;  %v1474_v16 = vand.u32 4294901760, %v1473_v43  ;;  %v5646_v56 = vld [vmem:[#allocation13_spill] sm:$0xff]  ;;  %v5648_v43 = vld [vmem:[#allocation14_spill] sm:$0xff] }
  0xbe   :  { %v5639_v37 = vsel %vm4823_vm1, 4294967295, %v5638_v37  ;;  %v1481_v5 = vand.u32 4294901760, %v1480_v46  ;;  %v1487_v39 = vsub.f32 %v4686_v55, %v1486_v35  ;;  %vm5641_vm12 = vnez %v5518_v47  ;;  %3042 = vmatpush3.bf16.msk.msra.mxu0 %vm4823_vm1, %v5393_v40 }
  0xbf   :  { %5640 = vst [vmem:[#allocation31_spill] sm:$0xff] %v5639_v37  ;;  %vm5642_vm2 = vnez %v5521_v9  ;;  %v5643_v42 = vmov 0  ;;  %v1600_v15 = vand.u32 4294901760, %v1599_v49  ;;  %v1607_v44 = vand.u32 4294901760, %v1606_v28  ;;  %v5653_v28 = vld [vmem:[#allocation10_spill] sm:$0xff]  ;;  %3070 = vmatpush3.bf16.msra.mxu1 %v3069_v14 }
  0xc0   :  { %vm4833_vm11 = vmpackc.low %vm5642_vm2, %vm5641_vm12  ;;  %v1494_v0 = vsub.f32 %v4719_v58, %v1493_v57  ;;  %v1613_v30 = vsub.f32 %v4752_v54, %v1612_v34  ;;  %v1620_v7 = vsub.f32 %v4754_v53, %v1619_v18  ;;  %v1500_v47 = vand.u32 4294901760, %v4803_v4  ;;  %v5656_v54 = vld [vmem:[#allocation16_spill] sm:$0xff]  ;;  %v5658_v58 = vld [vmem:[#allocation17_spill] sm:$0xff]  ;;  %3072 = vmatprep.subr.bf16.mxu1 %v3071_v12 }
  0xc1   :  { %v5644_v42 = vsel %vm4833_vm11, 4294967295, %v5643_v42  ;;  %v5647_v9 = vand.u32 4294901760, %v5646_v56  ;;  %v5649_v46 = vand.u32 4294901760, %v5648_v43  ;;  %v5652_v49 = vand.u32 4294901760, %v5651_v29  ;;  %3044 = vmatprep.subr.msk.bf16.mxu0 %vm4833_vm11, %v5393_v40 }
  0xc2   :  { %5645 = vst [vmem:[#allocation32_spill] sm:$0xff] %v5644_v42  ;;  %v5654_v1 = vand.u32 4294901760, %v5653_v28  ;;  %v5657_v53 = vand.u32 4294901760, %v5656_v54  ;;  %v5659_v55 = vand.u32 4294901760, %v5658_v58  ;;  %v5661_v13 = vand.u32 4294901760, %v4124_v17 }
  0xc3   :  { %v4847_v21 = vpack.c.bf16 %v5649_v46, %v5647_v9  ;;  %v5662_v9 = vand.u32 4294901760, %v4131_v45  ;;  %v5665_v37 = vand.u32 4294901760, %v4203_v59  ;;  %vm5667_vm2 = vnez %v5525_v23  ;;  %3074 = vmatpush3.bf16.msra.mxu1 %v3073_v32 }
  0xc4   :  { %v4856_v20 = vpack.c.bf16 %v5654_v1, %v5652_v49  ;;  %v4862_v31 = vpack.c.bf16 %v5659_v55, %v5657_v53  ;;  %vm5668_vm5 = vnez %v5530_v3  ;;  %v1507_v55 = vand.u32 4294901760, %v4814_v11  ;;  %v5672_v49 = vld [vmem:[#allocation9_spill] sm:$0xff]  ;;  %v5680_v3 = vld [vmem:[#allocation23_spill] sm:$0xff]  ;;  %3076 = vmatprep.subr.bf16.mxu1 %v3075_v60 }
  0xc5   :  { %5650 = vst [vmem:[#allocation13_spill] sm:$0xff] %v4847_v21  ;;  %v4868_v46 = vpack.c.bf16 %v5662_v9, %v5661_v13  ;;  %v5664_v21 = vand.u32 4294901760, %v4165_v48  ;;  %vm4883_vm7 = vmpackc.low %vm5668_vm5, %vm5667_vm2  ;;  %v5671_v13 = vand.u32 4294901760, %v4221_v52  ;;  %v5675_v1 = vld [vmem:[#allocation21_spill] sm:$0xff]  ;;  %vm5685_vm12 = vnez %v5538_v24 }
  0xc6   :  { %5655 = vst [vmem:[#allocation14_spill] sm:$0xff] %v4856_v20  ;;  %5660 = vst [vmem:[#allocation15_spill] sm:$0xff] %v4862_v31  ;;  %v5676_v9 = vand.u32 4294901760, %v5675_v1  ;;  %v5681_v31 = vand.u32 4294901760, %v5680_v3  ;;  %v5682_v20 = vld [vmem:[#allocation24_spill] sm:$0xff]  ;;  %vm5686_vm2 = vnez %v5542_v62  ;;  %v5695_v24 = vand.u32 4294901760, %v4488_v25  ;;  %3046 = vmatpush3.bf16.msk.msra.mxu0 %vm4883_vm7, %v5393_v40 }
  0xc7   :  { %5663 = vst [vmem:[#allocation10_spill] sm:$0xff] %v4868_v46  ;;  %v4874_v41 = vpack.c.bf16 %v5665_v37, %v5664_v21  ;;  %v5673_v37 = vand.u32 4294901760, %v5672_v49  ;;  %v5683_v42 = vand.u32 4294901760, %v5682_v20  ;;  %vm4910_vm5 = vmpackc.low %vm5686_vm2, %vm5685_vm12  ;;  %v5696_v62 = vand.u32 4294901760, %v4490_v33 }
  0xc8   :  { %v5697_v12 = vand.u32 4294901760, %v4492_v8  ;;  %3048 = vmatprep.subr.msk.bf16.mxu0 %vm4910_vm5, %v5393_v40  ;;  %vm4960_vm12 = vmpackc.low %vm4590_vm14, %vm4575_vm9  ;;  %v5707_v32 = vand.u32 4294901760, %v4794_v36  ;;  %v3087_v2 = vpack.c.bf16 %v5648_v43, %v5646_v56  ;;  %v3089_v6 = vpack.c.bf16 %v5653_v28, %v5651_v29  ;;  %v5710_v56 = vld [vmem:[#allocation11_spill] sm:$0xff]  ;;  %v5711_v29 = vld [vmem:[#allocation25_spill] sm:$0xff] }
  0xc9   :  { %5666 = vst [vmem:[#allocation16_spill] sm:$0xff] %v4874_v41  ;;  %v4892_v21 = vpack.c.bf16 %v5673_v37, %v5671_v13  ;;  %v5677_v41 = vld [vmem:[#allocation22_spill] sm:$0xff]  ;;  %v4904_v59 = vpack.c.bf16 %v5683_v42, %v5681_v31  ;;  %v5689_v13 = vand.u32 4294901760, %v4403_v50  ;;  %v5693_v31 = vand.u32 4294901760, %v4480_v51  ;;  %vm4970_vm2 = vmpackc.low %vm4656_vm3, %vm4636_vm0 }
  0xca   :  { %v5678_v46 = vand.u32 4294901760, %v5677_v41  ;;  %3050 = vmatpush3.bf16.msk.msra.mxu0 %vm4960_vm12, %v5393_v40  ;;  %vm4987_vm9 = vmpackc.low %vm4725_vm8, %vm4707_vm15  ;;  %v3091_v22 = vpack.c.bf16 %v5658_v58, %v5656_v54  ;;  %v3095_v43 = vpack.c.bf16 %v5710_v56, %v4165_v48  ;;  %vm5712_vm14 = vnez %v5711_v29  ;;  %v5713_v54 = vld [vmem:[#allocation19_spill] sm:$0xff] }
  0xcb   :  { %5674 = vst [vmem:[#allocation17_spill] sm:$0xff] %v4892_v21  ;;  %5684 = vst [vmem:[#allocation21_spill] sm:$0xff] %v4904_v59  ;;  %v4930_v59 = vpack.c.bf16 %v5696_v62, %v5695_v24  ;;  %v3077_v24 = vpack.c.bf16 %v1481_v5, %v1474_v16  ;;  %v3079_v5 = vpack.c.bf16 %v1607_v44, %v1600_v15  ;;  %3052 = vmatprep.subr.msk.bf16.mxu0 %vm4970_vm2, %v5393_v40  ;;  %v5716_v48 = vld [vmem:[#allocation27_spill] sm:$0xff] }
  0xcc   :  { %v4898_v23 = vpack.c.bf16 %v5678_v46, %v5676_v9  ;;  %v5690_v46 = vand.u32 4294901760, %v4405_v26  ;;  %v5692_v9 = vand.u32 4294901760, %v4441_v61  ;;  %v3097_v58 = vpack.c.bf16 %v5672_v49, %v4221_v52 }
  0xcd   :  { %3078 = vmatpush3.bf16.msra.mxu1 %v3077_v24  ;;  %vm5717_vm3 = vnez %v5716_v48  ;;  %v5718_v28 = vand.u32 4294901760, %v4675_v38  ;;  %v3101_v52 = vpack.c.bf16 %v5682_v20, %v5680_v3  ;;  %v3103_v49 = vpack.c.bf16 %v4405_v26, %v4403_v50  ;;  %v5723_v26 = vld [vmem:[#allocation29_spill] sm:$0xff] }
  0xce   :  { %5679 = vst [vmem:[#allocation9_spill] sm:$0xff] %v4898_v23  ;;  %v4918_v37 = vpack.c.bf16 %v5690_v46, %v5689_v13  ;;  %v4924_v42 = vpack.c.bf16 %v5693_v31, %v5692_v9  ;;  %v5698_v23 = vand.u32 4294901760, %v4494_v19  ;;  %v5699_v13 = vand.u32 4294901760, %v4607_v10  ;;  %3080 = vmatprep.subr.bf16.mxu1 %v3079_v5  ;;  %3054 = vmatpush3.bf16.msk.msra.mxu0 %vm4987_vm9, %v5393_v40 }
  0xcf   :  { %v5700_v46 = vand.u32 4294901760, %v4609_v63  ;;  %v4944_v9 = vpack.c.bf16 %v1493_v57, %v1486_v35  ;;  %v4946_v31 = vpack.c.bf16 %v1619_v18, %v1612_v34  ;;  %v1488_v34 = vand.u32 4294901760, %v1487_v39  ;;  %3088 = vmatprep.subr.bf16.mxu0 %v3087_v2 }
  0xd0   :  { %5691 = vst [vmem:[#allocation22_spill] sm:$0xff] %v4918_v37  ;;  %5694 = vst [vmem:[#allocation23_spill] sm:$0xff] %v4924_v42  ;;  %v4936_v21 = vpack.c.bf16 %v5698_v23, %v5697_v12  ;;  %v4948_v42 = vpack.c.bf16 %v1507_v55, %v1500_v47  ;;  %v1495_v57 = vand.u32 4294901760, %v1494_v0  ;;  %v1501_v18 = vsub.f32 %v4803_v4, %v1500_v47  ;;  %v5739_v5 = vld [vmem:[#allocation16_spill] sm:$0xff] }
  0xd1   :  { %v4942_v37 = vpack.c.bf16 %v5700_v46, %v5699_v13  ;;  %v1508_v12 = vsub.f32 %v4814_v11, %v1507_v55  ;;  %v1614_v13 = vand.u32 4294901760, %v1613_v30  ;;  %v1621_v46 = vand.u32 4294901760, %v1620_v7 }
  0xd2   :  { %v1392_v39 = vsub.f32 %v4794_v36, %v5707_v32  ;;  %v3081_v60 = vpack.c.bf16 %v1495_v57, %v1488_v34  ;;  %v1502_v15 = vand.u32 4294901760, %v1501_v18  ;;  %v3093_v47 = vpack.c.bf16 %v4131_v45, %v4124_v17  ;;  %v5714_v45 = vld [vmem:[#allocation26_spill] sm:$0xff]  ;;  %v5736_v57 = vld [vmem:[#allocation15_spill] sm:$0xff] }
  0xd3   :  { %v1509_v44 = vand.u32 4294901760, %v1508_v12  ;;  %v3083_v0 = vpack.c.bf16 %v1621_v46, %v1614_v13  ;;  %vm5715_vm0 = vnez %v5714_v45  ;;  %v3099_v17 = vpack.c.bf16 %v5677_v41, %v5675_v1  ;;  %v5737_v18 = vld [vmem:[#allocation10_spill] sm:$0xff]  ;;  %v5740_v13 = vld [vmem:[#allocation17_spill] sm:$0xff] }
  0xd4   :  { %v1393_v30 = vand.u32 4294901760, %v1392_v39  ;;  %3082 = vmatpush3.bf16.msra.mxu1 %v3081_v60  ;;  %v3107_v20 = vpack.c.bf16 %v4490_v33, %v4488_v25  ;;  %v3109_v50 = vpack.c.bf16 %v4494_v19, %v4492_v8  ;;  %vm5724_vm15 = vnez %v5723_v26  ;;  %v5727_v25 = vld [vmem:[#allocation18_spill] sm:$0xff]  ;;  %v5728_v33 = vld [vmem:[#allocation4_spill] sm:$0xff] }
  0xd5   :  { %v3085_v7 = vpack.c.bf16 %v1509_v44, %v1502_v15  ;;  %3084 = vmatprep.subr.bf16.mxu1 %v3083_v0  ;;  %v3113_v24 = vpack.c.bf16 %v5728_v33, %v5727_v25  ;;  %v5730_v19 = vld [vmem:[#allocation20_spill] sm:$0xff]  ;;  %v5738_v12 = vmov %v5707_v32  ;;  %v5741_v46 = vld [vmem:[#allocation9_spill] sm:$0xff] }
  0xd6   :  { %1394 = vmatmul.mubr.f32.vlgmr.msra.gmra.mrb[6].mxu0 %v1393_v30  ;;  %v5731_v8 = vld [vmem:[#allocation28_spill] sm:$0xff] }
  0xd7   :  { %3090 = vmatpush3.bf16.msra.mxu0 %v3089_v6  ;;  %1761 = vmatprep.mubr.f32.mxu0 %v4675_v38  ;;  %v3105_v38 = vpack.c.bf16 %v4480_v51, %v4441_v61  ;;  %v3111_v61 = vpack.c.bf16 %v4609_v63, %v4607_v10  ;;  %v5725_v51 = vld [vmem:[#allocation30_spill] sm:$0xff]  ;;  %v3115_v62 = vpack.c.bf16 %v5731_v8, %v5730_v19  ;;  %v5733_v10 = vld [vmem:[#allocation13_spill] sm:$0xff]  ;;  %v5744_v39 = vld [vmem:[#allocation23_spill] sm:$0xff] }
  0xd8   :  { %3092 = vmatprep.subr.bf16.mxu0 %v3091_v22  ;;  %3086 = vmatpush3.bf16.msra.mxu1 %v3085_v7  ;;  %vm5726_vm8 = vnez %v5725_v51  ;;  %v3117_v63 = vpack.c.bf16 %v4814_v11, %v4803_v4  ;;  %v5734_v4 = vld [vmem:[#allocation14_spill] sm:$0xff]  ;;  %v5735_v11 = vld [vmem:[#allocation12_spill] sm:$0xff] }
  0xd9   :  { %3120 = vmatprep.subr.msk.bf16.mxu1 %vm5712_vm14, %v5393_v40  ;;  %v5743_v32 = vld [vmem:[#allocation22_spill] sm:$0xff] }
  0xdb   :  { %3094 = vmatpush3.bf16.msra.mxu0 %v3093_v47  ;;  %1626 = vmatmul.mubr.f32.vlgmr.msra.gmra.mrb[6].mxu1 %v5713_v54 }
  0xdc   :  { %3096 = vmatprep.subr.bf16.mxu0 %v3095_v43  ;;  %3122 = vmatpush3.bf16.msk.msra.mxu1 %vm5715_vm0, %v5393_v40 }
  0xdd   :  { %3124 = vmatprep.subr.msk.bf16.mxu1 %vm5717_vm3, %v5393_v40  ;;  %1868 = vmatprep.mubr.f32.mxu1 %v5718_v28 }
  0xdf   :  { %3098 = vmatpush3.bf16.msra.mxu0 %v3097_v58 }
  0xe0   :  { %3100 = vmatprep.subr.bf16.mxu0 %v3099_v17  ;;  %3126 = vmatpush3.bf16.msk.msra.mxu1 %vm4603_vm13, %v5393_v40 }
  0xe1   :  { %3128 = vmatprep.subr.msk.bf16.mxu1 %vm4667_vm4, %v5393_v40 }
  0xe3   :  { %3102 = vmatpush3.bf16.msra.mxu0 %v3101_v52 }
  0xe4   :  { %3104 = vmatprep.subr.bf16.mxu0 %v3103_v49  ;;  %3130 = vmatpush3.bf16.msk.msra.mxu1 %vm4682_vm10, %v5393_v40 }
  0xe5   :  { %3132 = vmatprep.subr.msk.bf16.mxu1 %vm4738_vm6, %v5393_v40 }
  0xe7   :  { %3106 = vmatpush3.bf16.msra.mxu0 %v3105_v38 }
  0xe8   :  { %3108 = vmatprep.subr.bf16.mxu0 %v3107_v20  ;;  %3134 = vmatpush3.bf16.msk.msra.mxu1 %vm5724_vm15, %v5393_v40 }
  0xe9   :  { %3136 = vmatprep.subr.msk.bf16.mxu1 %vm5726_vm8, %v5393_v40 }
  0xeb   :  { %3110 = vmatpush3.bf16.msra.mxu0 %v3109_v50 }
  0xec   :  { %3112 = vmatprep.subr.bf16.mxu0 %v3111_v61  ;;  %3138 = vmatpush3.bf16.msk.msra.mxu1 %vm4823_vm1, %v5393_v40 }
  0xed   :  { %3140 = vmatprep.subr.msk.bf16.mxu1 %vm4833_vm11, %v5393_v40 }
  0xef   :  { %3114 = vmatpush3.bf16.msra.mxu0 %v3113_v24 }
  0xf0   :  { %3116 = vmatprep.subr.bf16.mxu0 %v3115_v62  ;;  %3142 = vmatpush3.bf16.msk.msra.mxu1 %vm4883_vm7, %v5393_v40 }
  0xf1   :  { %3144 = vmatprep.subr.msk.bf16.mxu1 %vm4910_vm5, %v5393_v40 }
  0xf3   :  { %3118 = vmatpush3.bf16.msra.mxu0 %v3117_v63 }
  0xf4   :  { %3152 = vmatprep.subr.bf16.mxu0 %v5733_v10  ;;  %3146 = vmatpush3.bf16.msk.msra.mxu1 %vm4960_vm12, %v5393_v40 }
  0xf5   :  { %3148 = vmatprep.subr.msk.bf16.mxu1 %vm4970_vm2, %v5393_v40 }
  0xf6   :  { %1764 = vmatmul.mubr.f32.vlgmr.msra.gmra.mrb[8].mxu0 %v4794_v36  ;;  %v5742_v36 = vld [vmem:[#allocation21_spill] sm:$0xff] }
  0xf7   :  { %3154 = vmatpush3.bf16.msra.mxu0 %v5734_v4  ;;  %2038 = vmatprep.mubr.f32.mxu0 %v5735_v11 }
  0xf8   :  { %3156 = vmatprep.subr.bf16.mxu0 %v5736_v57  ;;  %3150 = vmatpush3.bf16.msk.msra.mxu1 %vm4987_vm9, %v5393_v40 }
  0xf9   :  { %3184 = vmatprep.subr.msk.bf16.mxu1 %vm5712_vm14, %v5393_v40 }
  0xfb   :  { %3158 = vmatpush3.bf16.msra.mxu0 %v5737_v18  ;;  %1872 = vmatmul.mubr.f32.vlgmr.msra.gmra.mrb[8].mxu1 %v5738_v12 }
  0xfc   :  { %3160 = vmatprep.subr.bf16.mxu0 %v5739_v5  ;;  %3186 = vmatpush3.bf16.msk.msra.mxu1 %vm5715_vm0, %v5393_v40 }
  0xfd   :  { %3188 = vmatprep.subr.msk.bf16.mxu1 %vm5717_vm3, %v5393_v40  ;;  %2142 = vmatprep.mubr.f32.mxu1 %v5735_v11 }
  0xff   :  { %3162 = vmatpush3.bf16.msra.mxu0 %v5740_v13 }
 0x100   :  { %3164 = vmatprep.subr.bf16.mxu0 %v5741_v46  ;;  %3190 = vmatpush3.bf16.msk.msra.mxu1 %vm4603_vm13, %v5393_v40 }
 0x101   :  { %3192 = vmatprep.subr.msk.bf16.mxu1 %vm4667_vm4, %v5393_v40  ;;  %vm2149_vm4 = vcmask 122880  }
 0x103   :  { %3166 = vmatpush3.bf16.msra.mxu0 %v5742_v36 }
 0x104   :  { %3168 = vmatprep.subr.bf16.mxu0 %v5743_v32  ;;  %3194 = vmatpush3.bf16.msk.msra.mxu1 %vm4682_vm10, %v5393_v40 }
 0x105   :  { %3196 = vmatprep.subr.msk.bf16.mxu1 %vm4738_vm6, %v5393_v40 }
 0x107   :  { %3170 = vmatpush3.bf16.msra.mxu0 %v5744_v39 }
 0x108   :  { %3172 = vmatprep.subr.bf16.mxu0 %v4930_v59  ;;  %3198 = vmatpush3.bf16.msk.msra.mxu1 %vm5724_vm15, %v5393_v40 }
 0x109   :  { %3200 = vmatprep.subr.msk.bf16.mxu1 %vm5726_vm8, %v5393_v40 }
 0x10b   :  { %3174 = vmatpush3.bf16.msra.mxu0 %v4936_v21 }
 0x10c   :  { %3176 = vmatprep.subr.bf16.mxu0 %v4942_v37  ;;  %3202 = vmatpush3.bf16.msk.msra.mxu1 %vm4823_vm1, %v5393_v40 }
 0x10d   :  { %3204 = vmatprep.subr.msk.bf16.mxu1 %vm4833_vm11, %v5393_v40 }
 0x10f   :  { %3178 = vmatpush3.bf16.msra.mxu0 %v4944_v9 }
 0x110   :  { %3180 = vmatprep.subr.bf16.mxu0 %v4946_v31  ;;  %3206 = vmatpush3.bf16.msk.msra.mxu1 %vm4883_vm7, %v5393_v40 }
 0x111   :  { %3208 = vmatprep.subr.msk.bf16.mxu1 %vm4910_vm5, %v5393_v40 }
 0x113   :  { %3182 = vmatpush3.bf16.msra.mxu0 %v4948_v42 }
 0x114   :  { %3210 = vmatpush3.bf16.msk.msra.mxu1 %vm4960_vm12, %v5393_v40 }
 0x115   :  { %3212 = vmatprep.subr.msk.bf16.mxu1 %vm4970_vm2, %v5393_v40 }
 0x116   :  { %2040 = vmatmul.mubr.f32.vlgmr.msra.gmra.mrb[10].mxu0 %v5713_v54 }
 0x118   :  { %3214 = vmatpush3.bf16.msk.msra.mxu1 %vm4987_vm9, %v5393_v40 }
 0x11b   :  { %2144 = vmatmul.mubr.f32.vlgmr.msra.gmra.mrb[10].mxu1 %v5713_v54 }
 0x128   :  { %v2443_v59 = vpop.f32.mrb[0].mxu0 }
 0x129   :  { %v2444_v53 = vpop.f32.mrb[1].mxu0 }
 0x12a   :  { %v2445_v21 = vadd.f32 %v2444_v53, %v2443_v59 }
 0x12c   :  { %v2478_v14 = vpop.f32.mrb[0].mxu1 }
 0x12d   :  { %v2479_v37 = vpop.f32.mrb[1].mxu1 }
 0x12e   :  { %v2480_v42 = vadd.f32 %v2479_v37, %v2478_v14 }
 0x130   :  { %v766_v9 = vadd.f32 %v2480_v42, %v2445_v21 }
 0x148   :  { %v2513_v31 = vpop.f32.mrb[2].mxu0 }
 0x149   :  { %v2514_v35 = vpop.f32.mrb[3].mxu0 }
 0x14a   :  { %v2515_v2 = vadd.f32 %v2514_v35, %v2513_v31 }
 0x14c   :  { %v904_v16 = vadd.f32 %v2515_v2, %v766_v9 }
 0x157   :  { %v2548_v60 = vpop.f32.mrb[2].mxu1 }
 0x158   :  { %v2549_v15 = vpop.f32.mrb[3].mxu1 }
 0x159   :  { %v2550_v44 = vadd.f32 %v2549_v15, %v2548_v60 }
 0x15b   :  { %v1012_v0 = vadd.f32 %v2550_v44, %v904_v16 }
 0x16f   :  { %v2583_v30 = vpop.f32.mrb[4].mxu0 }
 0x170   :  { %v2584_v27 = vpop.f32.mrb[5].mxu0 }
 0x171   :  { %v2585_v40 = vadd.f32 %v2584_v27, %v2583_v30 }
 0x173   :  { %v1180_v6 = vadd.f32 %v2585_v40, %v1012_v0 }
 0x17f   :  { %v2618_v22 = vpop.f32.mrb[4].mxu1 }
 0x180   :  { %v2619_v7 = vpop.f32.mrb[5].mxu1 }
 0x181   :  { %v2620_v47 = vadd.f32 %v2619_v7, %v2618_v22 }
 0x183   :  { %v1284_v56 = vadd.f32 %v2620_v47, %v1180_v6 }
 0x1a9   :  { %v2653_v43 = vpop.f32.mrb[6].mxu0 }
 0x1aa   :  { %v2654_v29 = vpop.f32.mrb[7].mxu0 }
 0x1ab   :  { %v2655_v58 = vadd.f32 %v2654_v29, %v2653_v43 }
 0x1ad   :  { %v1396_v54 = vadd.f32 %v2655_v58, %v1284_v56 }
 0x1ae   :  { %v2688_v45 = vpop.f32.mrb[6].mxu1 }
 0x1af   :  { %v2689_v17 = vpop.f32.mrb[7].mxu1 }
 0x1b0   :  { %v2690_v48 = vadd.f32 %v2689_v17, %v2688_v45 }
 0x1b2   :  { %v1628_v28 = vadd.f32 %v2690_v48, %v1396_v54 }
 0x1c9   :  { %v2723_v52 = vpop.f32.mrb[8].mxu0 }
 0x1ca   :  { %v2724_v55 = vpop.f32.mrb[9].mxu0 }
 0x1cb   :  { %v2725_v49 = vadd.f32 %v2724_v55, %v2723_v52 }
 0x1cd   :  { %v1766_v41 = vadd.f32 %v2725_v49, %v1628_v28 }
 0x1ce   :  { %v2758_v38 = vpop.f32.mrb[8].mxu1 }
 0x1cf   :  { %v2759_v1 = vpop.f32.mrb[9].mxu1 }
 0x1d0   :  { %v2760_v20 = vadd.f32 %v2759_v1, %v2758_v38 }
 0x1d2   :  { %v1874_v3 = vadd.f32 %v2760_v20, %v1766_v41 }
 0x1e9   :  { %v2793_v50 = vpop.f32.mrb[10].mxu0 }
 0x1ea   :  { %v2794_v26 = vpop.f32.mrb[11].mxu0 }
 0x1eb   :  { %v2795_v61 = vadd.f32 %v2794_v26, %v2793_v50 }
 0x1ed   :  { %v2042_v51 = vadd.f32 %v2795_v61, %v1874_v3 }
 0x1ee   :  { %v2828_v25 = vpop.f32.mrb[10].mxu1 }
 0x1ef   :  { %v2829_v33 = vpop.f32.mrb[11].mxu1 }
 0x1f0   :  { %v2830_v24 = vadd.f32 %v2829_v33, %v2828_v25 }
 0x1f2   :  { %v2146_v23 = vadd.f32 %v2830_v24, %v2042_v51 }
 0x1f4   :  { %2150 = vst.msk [vmem:[%s5154_s2] sm:$0x1] %vm2149_vm4, %v2146_v23 }

</bundles_post_ra>
